<compile_context>
chip_gen: v7x
topology: tpu7x:2x2x1
jax: 0.10.0
libtpu: 0.0.40
codegen_flags: <defaults>
</compile_context>

<pallas_src>
import functools

import jax
import jax.numpy as jnp
from jax.experimental import pallas as pl
from jax.experimental.pallas import tpu as pltpu


def _mlp_kernel(ids_ref, wf_ref, b1_ref, w2_ref, b2_ref, out_ref, *, seq_len, vpad):
    """One batch tile: one-hot MXU "gather" -> bias -> ReLU -> matmul -> bias.

    ids_ref: [tb, L]        int32 VMEM block (per-tile token ids)
    wf_ref:  [L, Vpad, Hp]  bf16  VMEM-resident (embedding folded into Linear1)
    b1_ref:  [1, Hp]        f32
    w2_ref:  [Hp, Cp]       bf16  VMEM-resident
    b2_ref:  [1, Cp]        f32
    out_ref: [tb, Cp]       f32
    """
    tb = out_ref.shape[0]
    hp = b1_ref.shape[-1]

    ids = ids_ref[...]                                               # [tb, L] int32
    col = jax.lax.broadcasted_iota(jnp.int32, (tb, vpad), 1)         # lane index 0..Vpad-1

    # h = sum_l onehot(ids[:, l]) @ Wf[l]; onehot entries are exactly 0/1, so each matmul
    # selects Wf rows exactly (f32 accumulation on the MXU). seq_len is a small compile-time
    # constant, so the loop is fully unrolled (LLO can schedule across the 16 tiny matmuls).
    acc = jnp.zeros((tb, hp), jnp.float32)
    for l in range(seq_len):
        onehot = (col == ids[:, l:l + 1]).astype(jnp.bfloat16)       # [tb, Vpad]
        acc += jnp.dot(onehot, wf_ref[l], preferred_element_type=jnp.float32)

    h = jnp.maximum(acc + b1_ref[...], 0.0)                          # bias + ReLU in f32
    y = jnp.dot(h.astype(jnp.bfloat16), w2_ref[...],
                preferred_element_type=jnp.float32) + b2_ref[...]
    out_ref[...] = y.astype(out_ref.dtype)


def mlp_classifier_forward(token_ids, emb_table, w1, b1, w2, b2, *, block_b=None):
    """MLPClassifier forward.

    token_ids: [B, L] int32
    emb_table: [V, E] f32
    w1: [L*E, H], b1: [H]     (weights stored [in, out], i.e. transposed vs PyTorch)
    w2: [H, C],   b2: [C]
    returns: [B, C] f32 logits
    """
    B, L = token_ids.shape
    V, E = emb_table.shape
    D_in, H = w1.shape
    C = w2.shape[1]
    assert D_in == L * E, "w1 first dim must equal L * E (Flatten of [B, L, E])"

    LANES = 128
    Vp = pl.cdiv(V, LANES) * LANES     # lane-dense one-hot / folded-weight K dim
    Hp = pl.cdiv(H, LANES) * LANES     # lane-dense hidden dim
    Cp = pl.cdiv(C, LANES) * LANES     # lane-dense output dim

    # Fold the embedding into Linear1 (one-time f32 matmul in the wrapper):
    #   Wf[l] = emb_padded @ W1[l*E:(l+1)*E, :]    -> [L, Vp, Hp]
    # Padded vocab rows are zero and are never selected (ids < V); padded hidden columns are
    # zero (zero bias, zero W2 rows), so they contribute exactly zero.
    embp = jnp.zeros((Vp, E), jnp.float32).at[:V, :].set(emb_table.astype(jnp.float32))
    w1_leh = w1.astype(jnp.float32).reshape(L, E, H)
    wf = jnp.einsum('ve,leh->lvh', embp, w1_leh)                       # [L, Vp, H] f32
    wf = (jnp.zeros((L, Vp, Hp), jnp.float32).at[:, :, :H].set(wf)
          ).astype(jnp.bfloat16)

    b1p = jnp.zeros((1, Hp), jnp.float32).at[:, :H].set(
        b1.reshape(1, H).astype(jnp.float32))
    w2p = jnp.zeros((Hp, Cp), jnp.bfloat16).at[:H, :C].set(w2.astype(jnp.bfloat16))
    b2p = jnp.zeros((1, Cp), jnp.float32).at[:, :C].set(
        b2.reshape(1, C).astype(jnp.float32))

    # Batch tile: >= 2 "parallel" grid steps when possible (v7x: 2 TensorCores), <= 256 rows,
    # rounded up to a multiple of 8 sublanes.
    if block_b is None:
        tb = min(256, max(8, ((pl.cdiv(B, 2) + 7) // 8) * 8))
    else:
        tb = block_b
    n_tiles = pl.cdiv(B, tb)
    B_pad = n_tiles * tb

    # Pad batch with token id 0 (valid in-range row); padded rows are sliced away below.
    ids = token_ids.astype(jnp.int32)
    if B_pad != B:
        ids = jnp.concatenate([ids, jnp.zeros((B_pad - B, L), jnp.int32)], axis=0)

    kernel = functools.partial(_mlp_kernel, seq_len=L, vpad=Vp)

    grid_spec = pl.GridSpec(
        grid=(n_tiles,),
        in_specs=[
            pl.BlockSpec((tb, L), lambda i: (i, 0)),          # per-tile ids (VMEM)
            pl.BlockSpec((L, Vp, Hp), lambda i: (0, 0, 0)),   # folded emb@W1 (resident)
            pl.BlockSpec((1, Hp), lambda i: (0, 0)),          # b1
            pl.BlockSpec((Hp, Cp), lambda i: (0, 0)),         # W2 (resident)
            pl.BlockSpec((1, Cp), lambda i: (0, 0)),          # b2
        ],
        out_specs=pl.BlockSpec((tb, Cp), lambda i: (i, 0)),
    )

    out_padded = pl.pallas_call(
        kernel,
        out_shape=jax.ShapeDtypeStruct((B_pad, Cp), jnp.float32),
        grid_spec=grid_spec,
        compiler_params=pltpu.CompilerParams(
            dimension_semantics=("parallel",),      # independent batch tiles (2 TCs on v7x)
            vmem_limit_bytes=32 * 1024 * 1024,      # resident weights ~1.2 MiB; safe everywhere
        ),
    )(ids, wf, b1p, w2p, b2p)

    return out_padded[:B, :C]


if __name__ == "__main__":
    # Small deterministic configuration consistent with the module's __init__.
    vocab_size = 100
    emb_dim = 8
    max_seq_len = 16
    hidden_dim = 32
    num_classes = 2
    batch = 32          # -> 2 batch tiles of 16 (exercises the parallel batch grid)

    key = jax.random.PRNGKey(0)
    k_emb, k_w1, k_b1, k_w2, k_b2, k_ids = jax.random.split(key, 6)

    emb_table = jax.random.normal(k_emb, (vocab_size, emb_dim), dtype=jnp.float32) * 0.1
    # Weights stored as [in, out] (transpose of PyTorch's [out, in]).
    w1 = jax.random.normal(k_w1, (emb_dim * max_seq_len, hidden_dim), dtype=jnp.float32) * 0.05
    b1 = jax.random.normal(k_b1, (hidden_dim,), dtype=jnp.float32) * 0.01
    w2 = jax.random.normal(k_w2, (hidden_dim, num_classes), dtype=jnp.float32) * 0.05
    b2 = jax.random.normal(k_b2, (num_classes,), dtype=jnp.float32) * 0.01

    token_ids = jax.random.randint(
        k_ids, (batch, max_seq_len), 0, vocab_size, dtype=jnp.int32)

    out = mlp_classifier_forward(token_ids, emb_table, w1, b1, w2, b2)
    out = jax.block_until_ready(out)

    # Reference: pure-f32 math matching the PyTorch module. The kernel uses bf16 MXU weight
    # inputs with f32 accumulation, so allow bf16-level tolerance.
    x_ref = jnp.take(emb_table, token_ids, axis=0).reshape(batch, -1)
    h_ref = jnp.maximum(x_ref @ w1 + b1, 0.0)
    y_ref = h_ref @ w2 + b2

    assert out.shape == (batch, num_classes)
    assert jnp.allclose(out, y_ref, atol=2e-3, rtol=2e-2), "mismatch vs reference"

    print("KERNEL_OK")
</pallas_src>

<mosaic_0001>
module attributes {stable_mosaic.version = 11 : i64} {
  func.func @_mlp_kernel(%arg0: i32, %arg1: memref<16x16xi32, #tpu.memory_space<vmem>>, %arg2: memref<16x128x128xbf16, #tpu.memory_space<vmem>>, %arg3: memref<1x128xf32, #tpu.memory_space<vmem>>, %arg4: memref<128x128xbf16, #tpu.memory_space<vmem>>, %arg5: memref<1x128xf32, #tpu.memory_space<vmem>>, %arg6: memref<16x128xf32, #tpu.memory_space<vmem>>) attributes {dimension_semantics = [#tpu.dimension_semantics<parallel>], iteration_bounds = array<i64: 2>, scalar_prefetch = 0 : i64, scratch_operands = 0 : i64, tpu.core_type = #tpu.core_type<tc>, window_params = [{transform_indices = @transform_0, window_bounds = array<i64: 16, 16>}, {pipeline_mode = #tpu.pipeline_mode<synchronous>, transform_indices = @transform_1, window_bounds = array<i64: 16, 128, 128>}, {pipeline_mode = #tpu.pipeline_mode<synchronous>, transform_indices = @transform_2, window_bounds = array<i64: 1, 128>}, {pipeline_mode = #tpu.pipeline_mode<synchronous>, transform_indices = @transform_3, window_bounds = array<i64: 128, 128>}, {pipeline_mode = #tpu.pipeline_mode<synchronous>, transform_indices = @transform_4, window_bounds = array<i64: 1, 128>}, {transform_indices = @transform_5, window_bounds = array<i64: 16, 128>}]} {
    %c0 = arith.constant 0 : index
    %c0_0 = arith.constant 0 : index
    %0 = vector.load %arg1[%c0, %c0_0] : memref<16x16xi32, #tpu.memory_space<vmem>>, vector<16x16xi32>
    %1 = tpu.iota {dimensions = array<i32: 1>} : vector<16x128xi32>
    %cst = arith.constant 0.000000e+00 : f32
    %2 = vector.broadcast %cst : f32 to vector<16x128xf32>
    %3 = vector.extract_strided_slice %0 {offsets = [0, 0], sizes = [16, 1], strides = [1, 1]} : vector<16x16xi32> to vector<16x1xi32>
    %4 = vector.broadcast %3 : vector<16x1xi32> to vector<16x128xi32>
    %5 = arith.cmpi eq, %1, %4 : vector<16x128xi32>
    %6 = arith.extui %5 : vector<16x128xi1> to vector<16x128xi32>
    %7 = arith.sitofp %6 : vector<16x128xi32> to vector<16x128xf32>
    %8 = arith.truncf %7 : vector<16x128xf32> to vector<16x128xbf16>
    %c0_1 = arith.constant 0 : index
    %c0_2 = arith.constant 0 : index
    %c0_3 = arith.constant 0 : index
    %9 = vector.load %arg2[%c0_1, %c0_2, %c0_3] : memref<16x128x128xbf16, #tpu.memory_space<vmem>>, vector<1x128x128xbf16>
    %10 = vector.shape_cast %9 : vector<1x128x128xbf16> to vector<128x128xbf16>
    %cst_4 = arith.constant dense<0.000000e+00> : vector<16x128xf32>
    %11 = tpu.matmul %8, %10, %cst_4 {dimension_numbers = #tpu.dot_dimension_numbers<[1], [0], [0], [1], [0, 0, 1, 1], [], []>} : vector<16x128xbf16>, vector<128x128xbf16>, vector<16x128xf32> -> vector<16x128xf32>
    %12 = arith.addf %2, %11 : vector<16x128xf32>
    %13 = vector.extract_strided_slice %0 {offsets = [0, 1], sizes = [16, 1], strides = [1, 1]} : vector<16x16xi32> to vector<16x1xi32>
    %14 = vector.broadcast %13 : vector<16x1xi32> to vector<16x128xi32>
    %15 = arith.cmpi eq, %1, %14 : vector<16x128xi32>
    %16 = arith.extui %15 : vector<16x128xi1> to vector<16x128xi32>
    %17 = arith.sitofp %16 : vector<16x128xi32> to vector<16x128xf32>
    %18 = arith.truncf %17 : vector<16x128xf32> to vector<16x128xbf16>
    %c1 = arith.constant 1 : index
    %c0_5 = arith.constant 0 : index
    %c0_6 = arith.constant 0 : index
    %19 = vector.load %arg2[%c1, %c0_5, %c0_6] : memref<16x128x128xbf16, #tpu.memory_space<vmem>>, vector<1x128x128xbf16>
    %20 = vector.shape_cast %19 : vector<1x128x128xbf16> to vector<128x128xbf16>
    %cst_7 = arith.constant dense<0.000000e+00> : vector<16x128xf32>
    %21 = tpu.matmul %18, %20, %cst_7 {dimension_numbers = #tpu.dot_dimension_numbers<[1], [0], [0], [1], [0, 0, 1, 1], [], []>} : vector<16x128xbf16>, vector<128x128xbf16>, vector<16x128xf32> -> vector<16x128xf32>
    %22 = arith.addf %12, %21 : vector<16x128xf32>
    %23 = vector.extract_strided_slice %0 {offsets = [0, 2], sizes = [16, 1], strides = [1, 1]} : vector<16x16xi32> to vector<16x1xi32>
    %24 = vector.broadcast %23 : vector<16x1xi32> to vector<16x128xi32>
    %25 = arith.cmpi eq, %1, %24 : vector<16x128xi32>
    %26 = arith.extui %25 : vector<16x128xi1> to vector<16x128xi32>
    %27 = arith.sitofp %26 : vector<16x128xi32> to vector<16x128xf32>
    %28 = arith.truncf %27 : vector<16x128xf32> to vector<16x128xbf16>
    %c2 = arith.constant 2 : index
    %c0_8 = arith.constant 0 : index
    %c0_9 = arith.constant 0 : index
    %29 = vector.load %arg2[%c2, %c0_8, %c0_9] : memref<16x128x128xbf16, #tpu.memory_space<vmem>>, vector<1x128x128xbf16>
    %30 = vector.shape_cast %29 : vector<1x128x128xbf16> to vector<128x128xbf16>
    %cst_10 = arith.constant dense<0.000000e+00> : vector<16x128xf32>
    %31 = tpu.matmul %28, %30, %cst_10 {dimension_numbers = #tpu.dot_dimension_numbers<[1], [0], [0], [1], [0, 0, 1, 1], [], []>} : vector<16x128xbf16>, vector<128x128xbf16>, vector<16x128xf32> -> vector<16x128xf32>
    %32 = arith.addf %22, %31 : vector<16x128xf32>
    %33 = vector.extract_strided_slice %0 {offsets = [0, 3], sizes = [16, 1], strides = [1, 1]} : vector<16x16xi32> to vector<16x1xi32>
    %34 = vector.broadcast %33 : vector<16x1xi32> to vector<16x128xi32>
    %35 = arith.cmpi eq, %1, %34 : vector<16x128xi32>
    %36 = arith.extui %35 : vector<16x128xi1> to vector<16x128xi32>
    %37 = arith.sitofp %36 : vector<16x128xi32> to vector<16x128xf32>
    %38 = arith.truncf %37 : vector<16x128xf32> to vector<16x128xbf16>
    %c3 = arith.constant 3 : index
    %c0_11 = arith.constant 0 : index
    %c0_12 = arith.constant 0 : index
    %39 = vector.load %arg2[%c3, %c0_11, %c0_12] : memref<16x128x128xbf16, #tpu.memory_space<vmem>>, vector<1x128x128xbf16>
    %40 = vector.shape_cast %39 : vector<1x128x128xbf16> to vector<128x128xbf16>
    %cst_13 = arith.constant dense<0.000000e+00> : vector<16x128xf32>
    %41 = tpu.matmul %38, %40, %cst_13 {dimension_numbers = #tpu.dot_dimension_numbers<[1], [0], [0], [1], [0, 0, 1, 1], [], []>} : vector<16x128xbf16>, vector<128x128xbf16>, vector<16x128xf32> -> vector<16x128xf32>
    %42 = arith.addf %32, %41 : vector<16x128xf32>
    %43 = vector.extract_strided_slice %0 {offsets = [0, 4], sizes = [16, 1], strides = [1, 1]} : vector<16x16xi32> to vector<16x1xi32>
    %44 = vector.broadcast %43 : vector<16x1xi32> to vector<16x128xi32>
    %45 = arith.cmpi eq, %1, %44 : vector<16x128xi32>
    %46 = arith.extui %45 : vector<16x128xi1> to vector<16x128xi32>
    %47 = arith.sitofp %46 : vector<16x128xi32> to vector<16x128xf32>
    %48 = arith.truncf %47 : vector<16x128xf32> to vector<16x128xbf16>
    %c4 = arith.constant 4 : index
    %c0_14 = arith.constant 0 : index
    %c0_15 = arith.constant 0 : index
    %49 = vector.load %arg2[%c4, %c0_14, %c0_15] : memref<16x128x128xbf16, #tpu.memory_space<vmem>>, vector<1x128x128xbf16>
    %50 = vector.shape_cast %49 : vector<1x128x128xbf16> to vector<128x128xbf16>
    %cst_16 = arith.constant dense<0.000000e+00> : vector<16x128xf32>
    %51 = tpu.matmul %48, %50, %cst_16 {dimension_numbers = #tpu.dot_dimension_numbers<[1], [0], [0], [1], [0, 0, 1, 1], [], []>} : vector<16x128xbf16>, vector<128x128xbf16>, vector<16x128xf32> -> vector<16x128xf32>
    %52 = arith.addf %42, %51 : vector<16x128xf32>
    %53 = vector.extract_strided_slice %0 {offsets = [0, 5], sizes = [16, 1], strides = [1, 1]} : vector<16x16xi32> to vector<16x1xi32>
    %54 = vector.broadcast %53 : vector<16x1xi32> to vector<16x128xi32>
    %55 = arith.cmpi eq, %1, %54 : vector<16x128xi32>
    %56 = arith.extui %55 : vector<16x128xi1> to vector<16x128xi32>
    %57 = arith.sitofp %56 : vector<16x128xi32> to vector<16x128xf32>
    %58 = arith.truncf %57 : vector<16x128xf32> to vector<16x128xbf16>
    %c5 = arith.constant 5 : index
    %c0_17 = arith.constant 0 : index
    %c0_18 = arith.constant 0 : index
    %59 = vector.load %arg2[%c5, %c0_17, %c0_18] : memref<16x128x128xbf16, #tpu.memory_space<vmem>>, vector<1x128x128xbf16>
    %60 = vector.shape_cast %59 : vector<1x128x128xbf16> to vector<128x128xbf16>
    %cst_19 = arith.constant dense<0.000000e+00> : vector<16x128xf32>
    %61 = tpu.matmul %58, %60, %cst_19 {dimension_numbers = #tpu.dot_dimension_numbers<[1], [0], [0], [1], [0, 0, 1, 1], [], []>} : vector<16x128xbf16>, vector<128x128xbf16>, vector<16x128xf32> -> vector<16x128xf32>
    %62 = arith.addf %52, %61 : vector<16x128xf32>
    %63 = vector.extract_strided_slice %0 {offsets = [0, 6], sizes = [16, 1], strides = [1, 1]} : vector<16x16xi32> to vector<16x1xi32>
    %64 = vector.broadcast %63 : vector<16x1xi32> to vector<16x128xi32>
    %65 = arith.cmpi eq, %1, %64 : vector<16x128xi32>
    %66 = arith.extui %65 : vector<16x128xi1> to vector<16x128xi32>
    %67 = arith.sitofp %66 : vector<16x128xi32> to vector<16x128xf32>
    %68 = arith.truncf %67 : vector<16x128xf32> to vector<16x128xbf16>
    %c6 = arith.constant 6 : index
    %c0_20 = arith.constant 0 : index
    %c0_21 = arith.constant 0 : index
    %69 = vector.load %arg2[%c6, %c0_20, %c0_21] : memref<16x128x128xbf16, #tpu.memory_space<vmem>>, vector<1x128x128xbf16>
    %70 = vector.shape_cast %69 : vector<1x128x128xbf16> to vector<128x128xbf16>
    %cst_22 = arith.constant dense<0.000000e+00> : vector<16x128xf32>
    %71 = tpu.matmul %68, %70, %cst_22 {dimension_numbers = #tpu.dot_dimension_numbers<[1], [0], [0], [1], [0, 0, 1, 1], [], []>} : vector<16x128xbf16>, vector<128x128xbf16>, vector<16x128xf32> -> vector<16x128xf32>
    %72 = arith.addf %62, %71 : vector<16x128xf32>
    %73 = vector.extract_strided_slice %0 {offsets = [0, 7], sizes = [16, 1], strides = [1, 1]} : vector<16x16xi32> to vector<16x1xi32>
    %74 = vector.broadcast %73 : vector<16x1xi32> to vector<16x128xi32>
    %75 = arith.cmpi eq, %1, %74 : vector<16x128xi32>
    %76 = arith.extui %75 : vector<16x128xi1> to vector<16x128xi32>
    %77 = arith.sitofp %76 : vector<16x128xi32> to vector<16x128xf32>
    %78 = arith.truncf %77 : vector<16x128xf32> to vector<16x128xbf16>
    %c7 = arith.constant 7 : index
    %c0_23 = arith.constant 0 : index
    %c0_24 = arith.constant 0 : index
    %79 = vector.load %arg2[%c7, %c0_23, %c0_24] : memref<16x128x128xbf16, #tpu.memory_space<vmem>>, vector<1x128x128xbf16>
    %80 = vector.shape_cast %79 : vector<1x128x128xbf16> to vector<128x128xbf16>
    %cst_25 = arith.constant dense<0.000000e+00> : vector<16x128xf32>
    %81 = tpu.matmul %78, %80, %cst_25 {dimension_numbers = #tpu.dot_dimension_numbers<[1], [0], [0], [1], [0, 0, 1, 1], [], []>} : vector<16x128xbf16>, vector<128x128xbf16>, vector<16x128xf32> -> vector<16x128xf32>
    %82 = arith.addf %72, %81 : vector<16x128xf32>
    %83 = vector.extract_strided_slice %0 {offsets = [0, 8], sizes = [16, 1], strides = [1, 1]} : vector<16x16xi32> to vector<16x1xi32>
    %84 = vector.broadcast %83 : vector<16x1xi32> to vector<16x128xi32>
    %85 = arith.cmpi eq, %1, %84 : vector<16x128xi32>
    %86 = arith.extui %85 : vector<16x128xi1> to vector<16x128xi32>
    %87 = arith.sitofp %86 : vector<16x128xi32> to vector<16x128xf32>
    %88 = arith.truncf %87 : vector<16x128xf32> to vector<16x128xbf16>
    %c8 = arith.constant 8 : index
    %c0_26 = arith.constant 0 : index
    %c0_27 = arith.constant 0 : index
    %89 = vector.load %arg2[%c8, %c0_26, %c0_27] : memref<16x128x128xbf16, #tpu.memory_space<vmem>>, vector<1x128x128xbf16>
    %90 = vector.shape_cast %89 : vector<1x128x128xbf16> to vector<128x128xbf16>
    %cst_28 = arith.constant dense<0.000000e+00> : vector<16x128xf32>
    %91 = tpu.matmul %88, %90, %cst_28 {dimension_numbers = #tpu.dot_dimension_numbers<[1], [0], [0], [1], [0, 0, 1, 1], [], []>} : vector<16x128xbf16>, vector<128x128xbf16>, vector<16x128xf32> -> vector<16x128xf32>
    %92 = arith.addf %82, %91 : vector<16x128xf32>
    %93 = vector.extract_strided_slice %0 {offsets = [0, 9], sizes = [16, 1], strides = [1, 1]} : vector<16x16xi32> to vector<16x1xi32>
    %94 = vector.broadcast %93 : vector<16x1xi32> to vector<16x128xi32>
    %95 = arith.cmpi eq, %1, %94 : vector<16x128xi32>
    %96 = arith.extui %95 : vector<16x128xi1> to vector<16x128xi32>
    %97 = arith.sitofp %96 : vector<16x128xi32> to vector<16x128xf32>
    %98 = arith.truncf %97 : vector<16x128xf32> to vector<16x128xbf16>
    %c9 = arith.constant 9 : index
    %c0_29 = arith.constant 0 : index
    %c0_30 = arith.constant 0 : index
    %99 = vector.load %arg2[%c9, %c0_29, %c0_30] : memref<16x128x128xbf16, #tpu.memory_space<vmem>>, vector<1x128x128xbf16>
    %100 = vector.shape_cast %99 : vector<1x128x128xbf16> to vector<128x128xbf16>
    %cst_31 = arith.constant dense<0.000000e+00> : vector<16x128xf32>
    %101 = tpu.matmul %98, %100, %cst_31 {dimension_numbers = #tpu.dot_dimension_numbers<[1], [0], [0], [1], [0, 0, 1, 1], [], []>} : vector<16x128xbf16>, vector<128x128xbf16>, vector<16x128xf32> -> vector<16x128xf32>
    %102 = arith.addf %92, %101 : vector<16x128xf32>
    %103 = vector.extract_strided_slice %0 {offsets = [0, 10], sizes = [16, 1], strides = [1, 1]} : vector<16x16xi32> to vector<16x1xi32>
    %104 = vector.broadcast %103 : vector<16x1xi32> to vector<16x128xi32>
    %105 = arith.cmpi eq, %1, %104 : vector<16x128xi32>
    %106 = arith.extui %105 : vector<16x128xi1> to vector<16x128xi32>
    %107 = arith.sitofp %106 : vector<16x128xi32> to vector<16x128xf32>
    %108 = arith.truncf %107 : vector<16x128xf32> to vector<16x128xbf16>
    %c10 = arith.constant 10 : index
    %c0_32 = arith.constant 0 : index
    %c0_33 = arith.constant 0 : index
    %109 = vector.load %arg2[%c10, %c0_32, %c0_33] : memref<16x128x128xbf16, #tpu.memory_space<vmem>>, vector<1x128x128xbf16>
    %110 = vector.shape_cast %109 : vector<1x128x128xbf16> to vector<128x128xbf16>
    %cst_34 = arith.constant dense<0.000000e+00> : vector<16x128xf32>
    %111 = tpu.matmul %108, %110, %cst_34 {dimension_numbers = #tpu.dot_dimension_numbers<[1], [0], [0], [1], [0, 0, 1, 1], [], []>} : vector<16x128xbf16>, vector<128x128xbf16>, vector<16x128xf32> -> vector<16x128xf32>
    %112 = arith.addf %102, %111 : vector<16x128xf32>
    %113 = vector.extract_strided_slice %0 {offsets = [0, 11], sizes = [16, 1], strides = [1, 1]} : vector<16x16xi32> to vector<16x1xi32>
    %114 = vector.broadcast %113 : vector<16x1xi32> to vector<16x128xi32>
    %115 = arith.cmpi eq, %1, %114 : vector<16x128xi32>
    %116 = arith.extui %115 : vector<16x128xi1> to vector<16x128xi32>
    %117 = arith.sitofp %116 : vector<16x128xi32> to vector<16x128xf32>
    %118 = arith.truncf %117 : vector<16x128xf32> to vector<16x128xbf16>
    %c11 = arith.constant 11 : index
    %c0_35 = arith.constant 0 : index
    %c0_36 = arith.constant 0 : index
    %119 = vector.load %arg2[%c11, %c0_35, %c0_36] : memref<16x128x128xbf16, #tpu.memory_space<vmem>>, vector<1x128x128xbf16>
    %120 = vector.shape_cast %119 : vector<1x128x128xbf16> to vector<128x128xbf16>
    %cst_37 = arith.constant dense<0.000000e+00> : vector<16x128xf32>
    %121 = tpu.matmul %118, %120, %cst_37 {dimension_numbers = #tpu.dot_dimension_numbers<[1], [0], [0], [1], [0, 0, 1, 1], [], []>} : vector<16x128xbf16>, vector<128x128xbf16>, vector<16x128xf32> -> vector<16x128xf32>
    %122 = arith.addf %112, %121 : vector<16x128xf32>
    %123 = vector.extract_strided_slice %0 {offsets = [0, 12], sizes = [16, 1], strides = [1, 1]} : vector<16x16xi32> to vector<16x1xi32>
    %124 = vector.broadcast %123 : vector<16x1xi32> to vector<16x128xi32>
    %125 = arith.cmpi eq, %1, %124 : vector<16x128xi32>
    %126 = arith.extui %125 : vector<16x128xi1> to vector<16x128xi32>
    %127 = arith.sitofp %126 : vector<16x128xi32> to vector<16x128xf32>
    %128 = arith.truncf %127 : vector<16x128xf32> to vector<16x128xbf16>
    %c12 = arith.constant 12 : index
    %c0_38 = arith.constant 0 : index
    %c0_39 = arith.constant 0 : index
    %129 = vector.load %arg2[%c12, %c0_38, %c0_39] : memref<16x128x128xbf16, #tpu.memory_space<vmem>>, vector<1x128x128xbf16>
    %130 = vector.shape_cast %129 : vector<1x128x128xbf16> to vector<128x128xbf16>
    %cst_40 = arith.constant dense<0.000000e+00> : vector<16x128xf32>
    %131 = tpu.matmul %128, %130, %cst_40 {dimension_numbers = #tpu.dot_dimension_numbers<[1], [0], [0], [1], [0, 0, 1, 1], [], []>} : vector<16x128xbf16>, vector<128x128xbf16>, vector<16x128xf32> -> vector<16x128xf32>
    %132 = arith.addf %122, %131 : vector<16x128xf32>
    %133 = vector.extract_strided_slice %0 {offsets = [0, 13], sizes = [16, 1], strides = [1, 1]} : vector<16x16xi32> to vector<16x1xi32>
    %134 = vector.broadcast %133 : vector<16x1xi32> to vector<16x128xi32>
    %135 = arith.cmpi eq, %1, %134 : vector<16x128xi32>
    %136 = arith.extui %135 : vector<16x128xi1> to vector<16x128xi32>
    %137 = arith.sitofp %136 : vector<16x128xi32> to vector<16x128xf32>
    %138 = arith.truncf %137 : vector<16x128xf32> to vector<16x128xbf16>
    %c13 = arith.constant 13 : index
    %c0_41 = arith.constant 0 : index
    %c0_42 = arith.constant 0 : index
    %139 = vector.load %arg2[%c13, %c0_41, %c0_42] : memref<16x128x128xbf16, #tpu.memory_space<vmem>>, vector<1x128x128xbf16>
    %140 = vector.shape_cast %139 : vector<1x128x128xbf16> to vector<128x128xbf16>
    %cst_43 = arith.constant dense<0.000000e+00> : vector<16x128xf32>
    %141 = tpu.matmul %138, %140, %cst_43 {dimension_numbers = #tpu.dot_dimension_numbers<[1], [0], [0], [1], [0, 0, 1, 1], [], []>} : vector<16x128xbf16>, vector<128x128xbf16>, vector<16x128xf32> -> vector<16x128xf32>
    %142 = arith.addf %132, %141 : vector<16x128xf32>
    %143 = vector.extract_strided_slice %0 {offsets = [0, 14], sizes = [16, 1], strides = [1, 1]} : vector<16x16xi32> to vector<16x1xi32>
    %144 = vector.broadcast %143 : vector<16x1xi32> to vector<16x128xi32>
    %145 = arith.cmpi eq, %1, %144 : vector<16x128xi32>
    %146 = arith.extui %145 : vector<16x128xi1> to vector<16x128xi32>
    %147 = arith.sitofp %146 : vector<16x128xi32> to vector<16x128xf32>
    %148 = arith.truncf %147 : vector<16x128xf32> to vector<16x128xbf16>
    %c14 = arith.constant 14 : index
    %c0_44 = arith.constant 0 : index
    %c0_45 = arith.constant 0 : index
    %149 = vector.load %arg2[%c14, %c0_44, %c0_45] : memref<16x128x128xbf16, #tpu.memory_space<vmem>>, vector<1x128x128xbf16>
    %150 = vector.shape_cast %149 : vector<1x128x128xbf16> to vector<128x128xbf16>
    %cst_46 = arith.constant dense<0.000000e+00> : vector<16x128xf32>
    %151 = tpu.matmul %148, %150, %cst_46 {dimension_numbers = #tpu.dot_dimension_numbers<[1], [0], [0], [1], [0, 0, 1, 1], [], []>} : vector<16x128xbf16>, vector<128x128xbf16>, vector<16x128xf32> -> vector<16x128xf32>
    %152 = arith.addf %142, %151 : vector<16x128xf32>
    %153 = vector.extract_strided_slice %0 {offsets = [0, 15], sizes = [16, 1], strides = [1, 1]} : vector<16x16xi32> to vector<16x1xi32>
    %154 = vector.broadcast %153 : vector<16x1xi32> to vector<16x128xi32>
    %155 = arith.cmpi eq, %1, %154 : vector<16x128xi32>
    %156 = arith.extui %155 : vector<16x128xi1> to vector<16x128xi32>
    %157 = arith.sitofp %156 : vector<16x128xi32> to vector<16x128xf32>
    %158 = arith.truncf %157 : vector<16x128xf32> to vector<16x128xbf16>
    %c15 = arith.constant 15 : index
    %c0_47 = arith.constant 0 : index
    %c0_48 = arith.constant 0 : index
    %159 = vector.load %arg2[%c15, %c0_47, %c0_48] : memref<16x128x128xbf16, #tpu.memory_space<vmem>>, vector<1x128x128xbf16>
    %160 = vector.shape_cast %159 : vector<1x128x128xbf16> to vector<128x128xbf16>
    %cst_49 = arith.constant dense<0.000000e+00> : vector<16x128xf32>
    %161 = tpu.matmul %158, %160, %cst_49 {dimension_numbers = #tpu.dot_dimension_numbers<[1], [0], [0], [1], [0, 0, 1, 1], [], []>} : vector<16x128xbf16>, vector<128x128xbf16>, vector<16x128xf32> -> vector<16x128xf32>
    %162 = arith.addf %152, %161 : vector<16x128xf32>
    %c0_50 = arith.constant 0 : index
    %c0_51 = arith.constant 0 : index
    %163 = vector.load %arg3[%c0_50, %c0_51] : memref<1x128xf32, #tpu.memory_space<vmem>>, vector<1x128xf32>
    %164 = vector.broadcast %163 : vector<1x128xf32> to vector<16x128xf32>
    %165 = arith.addf %162, %164 : vector<16x128xf32>
    %cst_52 = arith.constant 0.000000e+00 : f32
    %166 = vector.broadcast %cst_52 : f32 to vector<16x128xf32>
    %167 = arith.maximumf %165, %166 : vector<16x128xf32>
    %168 = arith.truncf %167 : vector<16x128xf32> to vector<16x128xbf16>
    %c0_53 = arith.constant 0 : index
    %c0_54 = arith.constant 0 : index
    %169 = vector.load %arg4[%c0_53, %c0_54] : memref<128x128xbf16, #tpu.memory_space<vmem>>, vector<128x128xbf16>
    %cst_55 = arith.constant dense<0.000000e+00> : vector<16x128xf32>
    %170 = tpu.matmul %168, %169, %cst_55 {dimension_numbers = #tpu.dot_dimension_numbers<[1], [0], [0], [1], [0, 0, 1, 1], [], []>} : vector<16x128xbf16>, vector<128x128xbf16>, vector<16x128xf32> -> vector<16x128xf32>
    %c0_56 = arith.constant 0 : index
    %c0_57 = arith.constant 0 : index
    %171 = vector.load %arg5[%c0_56, %c0_57] : memref<1x128xf32, #tpu.memory_space<vmem>>, vector<1x128xf32>
    %172 = vector.broadcast %171 : vector<1x128xf32> to vector<16x128xf32>
    %173 = arith.addf %170, %172 : vector<16x128xf32>
    %c0_58 = arith.constant 0 : index
    %c0_59 = arith.constant 0 : index
    %174 = vector.load %arg6[%c0_58, %c0_59] : memref<16x128xf32, #tpu.memory_space<vmem>>, vector<16x128xf32>
    tpu.vector_store %arg6[%c0_58, %c0_59], %173 {strides = array<i32>} : memref<16x128xf32, #tpu.memory_space<vmem>>, vector<16x128xf32>,
    return
  }
  func.func @transform_0(%arg0: i32) -> (i32, i32) {
    %c0_i32 = arith.constant 0 : i32
    %c0_i32_0 = arith.constant 0 : i32
    return %arg0, %c0_i32 : i32, i32
  }
  func.func @transform_1(%arg0: i32) -> (i32, i32, i32) {
    %c0_i32 = arith.constant 0 : i32
    %c0_i32_0 = arith.constant 0 : i32
    %c0_i32_1 = arith.constant 0 : i32
    %c0_i32_2 = arith.constant 0 : i32
    return %c0_i32, %c0_i32_0, %c0_i32_1 : i32, i32, i32
  }
  func.func @transform_2(%arg0: i32) -> (i32, i32) {
    %c0_i32 = arith.constant 0 : i32
    %c0_i32_0 = arith.constant 0 : i32
    %c0_i32_1 = arith.constant 0 : i32
    return %c0_i32, %c0_i32_0 : i32, i32
  }
  func.func @transform_3(%arg0: i32) -> (i32, i32) {
    %c0_i32 = arith.constant 0 : i32
    %c0_i32_0 = arith.constant 0 : i32
    %c0_i32_1 = arith.constant 0 : i32
    return %c0_i32, %c0_i32_0 : i32, i32
  }
  func.func @transform_4(%arg0: i32) -> (i32, i32) {
    %c0_i32 = arith.constant 0 : i32
    %c0_i32_0 = arith.constant 0 : i32
    %c0_i32_1 = arith.constant 0 : i32
    return %c0_i32, %c0_i32_0 : i32, i32
  }
  func.func @transform_5(%arg0: i32) -> (i32, i32) {
    %c0_i32 = arith.constant 0 : i32
    %c0_i32_0 = arith.constant 0 : i32
    return %arg0, %c0_i32 : i32, i32
  }
}

</mosaic_0001>

<bundles_post_ra>
// kernel: tpu_custom_call.1
= control target key start
LH: loop header
LB: loop body
LE: loop exit
PB: predicated region body
PF: predicated region fallthrough
CT: control target
= control target key end

     0   :  { %10 = vsyncpa [#allocation3], 0  ;;  %s3993_s0 = inlined_call_operand.vmem [shape: s32[32,16], index: 0, kind: input, shape index: {}]   ;;  %s3994_s1 = inlined_call_operand.hbm [shape: bf16[16,128,128], index: 1, kind: input, shape index: {}]   ;;  %s3995_s2 = inlined_call_operand.vmem [shape: f32[1,128], index: 2, kind: input, shape index: {}]   ;;  %s3996_s3 = inlined_call_operand.hbm [shape: bf16[128,128], index: 3, kind: input, shape index: {}]   ;;  %s3997_s4 = inlined_call_operand.vmem [shape: f32[1,128], index: 4, kind: input, shape index: {}]   ;;  %s3998_s5 = inlined_call_operand.hbm [shape: f32[32,128], index: 5, kind: output, shape index: {}]  }
   0x1   :  { %11 = vsyncpa [#allocation6], 0 }
   0x2   :  { %12 = vsyncpa [#allocation4], 0 }
   0x3   :  { %14 = vsyncpa [#allocation4 + $0x1], 0  ;;  %s3557_s18 = smov 0   ;;  %s3559_s19 = smov 0  }
   0x4   :  { %s3561_s20 = smov 0   ;;  %s3563_s21 = smov 0  }
   0x5 LB: > { %s3578_s22 = sadd.s32 4294967295, %s3499_s21   ;;  %s2416_s23 = sadd.s32 4294967294, %s3499_s21   ;;  %s3499_s21 = sphi %s3563_s21, %s4016_s21   ;;  %s3495_s20 = sphi %s3561_s20, %s4015_s20   ;;  %s3491_s19 = sphi %s3559_s19, %s4014_s19   ;;  %s3487_s18 = sphi %s3557_s18, %s4013_s18  }
   0x6   : > { %s3582_s24 = sadd.s32 1, %s3499_s21   ;;  %s137_s25 = sadd.s32 1, %s3495_s20 }
   0x7   : > { %s134_s26 = ssub.s32 %s3499_s21, %s3582_s24  ;;  %p147_p0 = scmp.ne.s32.totalorder %s3495_s20, %s3491_s19 }
   0x8   : > { %p135_p1 = scmp.eq.s32.totalorder %s134_s26, 0  ;;  %p148_p2 = scmp.eq.s32.totalorder %s3578_s22, 1 }
   0x9   : > { %p153_p3 = scmp.ne.s32.totalorder %s3491_s19, %s3487_s18  ;;  %p154_p4 = scmp.eq.s32.totalorder %s2416_s23, 1 }
   0xa   : > { %s3593_s27 = scalar_select %p135_p1, %s3495_s20, %s137_s25  }
   0xb   : > { %p3595_p5 = por %p148_p2, %p147_p0  ;;  %p3599_p6 = por %p154_p4, %p153_p3 }
   0xc   : > { %p2417_p7 = scmp.ge.s32.totalorder %s3499_s21, 1  ;;  %p161_p8 = scmp.lt.s32.totalorder %s3499_s21, 3 }
   0xd   : > { %s4002_s28 = scalar_select %p3595_p5, 1, 0 }
   0xe   : > { %s4003_s29 = scalar_select %p3599_p6, 1, 0 }
   0xf   : > { %p3999_p9 = scmp.eq.s32.totalorder %s3578_s22, 0  ;;  %p3606_p10 = pnand %p2417_p7, %p161_p8 }
  0x10   : > { %s3501_s6 = smov [#allocation2]   ;;  %s3502_s9 = smov [#allocation5]  }
  0x11   : > { %s4004_s30 = scalar_select %p3606_p10, 1, 0 }
  0x12   : > { %s173_s7 = sshll.u32 %s3501_s6, 4  ;;  %p3138_p11 = pneg %p3606_p10  ;;  %s174_s7 = int_to_ptr.vmem [resolvable:$true] %s173_s7 }
  0x13   : > { %s189_s10 = sshll.u32 %s3502_s9, 4  ;;  %s3373_s13 = scalar_lea.hbm %s3994_s1, 16384  ;;  %s3618_s10 = int_to_ptr.vmem [resolvable:$true] %s189_s10 }
  0x14   : > { %p3614_p12 = pnand %p3999_p9, %p3138_p11  ;;  %p3374_p13 = scmp.ne.s32.totalorder %s3994_s1, %s3373_s13 }
  0x15   : > { %p3380_p3 = scmp.lt.u32.totalorder %s3373_s13, %s3994_s1 }
  0x16   : > { %p3375_p0 = pneg %p3614_p12 }
  0x18   : > { %p3376_p1 = pnand %p3375_p0, %p3374_p13 }
  0x1a   : > { %p3377_p2 = pneg %p3376_p1 }
  0x1c   : > { %p3382_p4 = pnand %p3380_p3, %p3377_p2 }
  0x1e   : > { %3385 = shalt.err (!%p3382_p4)
}
  0x1f   : > { %s3386_s23 = scalar_lea.vmem %s174_s7, 16384  ;;  %p3394_p9 = scmp.lt.s32.totalorder %s174_s7, %s174_s7 }
  0x20   : > { %p3387_p7 = scmp.ne.s32.totalorder %s174_s7, %s3386_s23  ;;  %p3395_p6 = scmp.lt.s32.totalorder %s3386_s23, %s3386_s23 }
  0x22   : > { %p3389_p8 = pnand %p3387_p7, %p3375_p0  ;;  %p3396_p5 = por %p3395_p6, %p3394_p9 }
  0x24   : > { %p3390_p11 = pneg %p3389_p8 }
  0x26   : > { %p3397_p10 = pnand %p3396_p5, %p3390_p11 }
  0x28   : > { %3400 = shalt.err (!%p3397_p10)
}
  0x29   : > { %s3503_s25 = smov 64   ;;  %s3504_s26 = smov 4  }
  0x2a   : > { %3141 = dma.hbm_to_vmem [thread:$0]  (!%p3614_p12), %s3994_s1, 16384, %s174_s7, [#allocation3], %s3503_s25, %s3503_s25, %s3504_s26  }
  0x2b   : > { %s3401_s13 = scalar_lea.hbm %s3996_s3, 1024 }
  0x2c   : > { %p3402_p13 = scmp.ne.s32.totalorder %s3996_s3, %s3401_s13  ;;  %p3408_p9 = scmp.lt.u32.totalorder %s3401_s13, %s3996_s3 }
  0x2e   : > { %p3404_p5 = pnand %p3402_p13, %p3375_p0 }
  0x30   : > { %p3405_p6 = pneg %p3404_p5 }
  0x32   : > { %p3410_p10 = pnand %p3408_p9, %p3405_p6 }
  0x34   : > { %3413 = shalt.err (!%p3410_p10)
}
  0x35   : > { %s3414_s7 = scalar_lea.vmem %s3618_s10, 1024  ;;  %p3422_p4 = scmp.lt.s32.totalorder %s3618_s10, %s3618_s10 }
  0x36   : > { %p3415_p1 = scmp.ne.s32.totalorder %s3618_s10, %s3414_s7  ;;  %p3423_p7 = scmp.lt.s32.totalorder %s3414_s7, %s3414_s7 }
  0x38   : > { %p3417_p2 = pnand %p3415_p1, %p3375_p0  ;;  %p3424_p8 = por %p3423_p7, %p3422_p4 }
  0x3a   : > { %p3418_p3 = pneg %p3417_p2 }
  0x3c   : > { %p3425_p11 = pnand %p3424_p8, %p3418_p3 }
  0x3e   : > { %3428 = shalt.err (!%p3425_p11)
}
  0x3f   : > { %3144 = dma.hbm_to_vmem [thread:$0]  (!%p3614_p12), %s3996_s3, 1024, %s3618_s10, [#allocation6], %s3503_s25, %s3503_s25, %s3504_s26  }
  0x40   : > { %p4006_p13 = scmp.ne.s32.totalorder %s4004_s30, 0 }
  0x41   : > { %p4007_p5 = scmp.eq.s32.totalorder (!%p4006_p13), %s3578_s22, 0 }
  0x42   : > { %217 = sbr.rel (%p4006_p13) target bundleno = 899 (0x383), region = 40 }
  0x49   : > { %3474 = dma.done.wait (%p4007_p5), [#allocation3], 16384   ;;  %p4008_p0 = pmov %p4007_p5 }
  0x4b   : > { %3476 = vsyncadd (%p4008_p0), [#allocation3], 4294950912  ;;  %p4009_p6 = pmov %p4008_p0 }
  0x4c   : > { %p4010_p9 = pmov %p4008_p0 }
  0x4d   : > { %3478 = dma.done.wait (%p4009_p6), [#allocation6], 1024  }
  0x4e   : > { %3480 = vsyncadd (%p4010_p9), [#allocation6], 4294966272  ;;  %s2425_s8 = sshll.u32 %s3578_s22, 1  ;;  %v3505_v0 = vmov 1   ;;  %v3506_v1 = vmov 0   ;;  %v3507_v2 = vmov 0.0   ;;  %v259_v35 = vlaneseq }
  0x4f   : > { %3211 = vset.pattern.permute.xlu0 %v3505_v0  ;;  %3212 = vset.pattern.permute.xlu1 %v3506_v1  ;;  %p250_p12 = scmp.lt.s32.totalorder %s2425_s8, 3  ;;  %v3237_v5 = vld [vmem:[#allocation2 + $0x40] sm:$0xff]   ;;  %v3239_v7 = vld [vmem:[#allocation2 + $0x48] sm:$0xff]   ;;  %v3241_v9 = vld [vmem:[#allocation2 + $0x50] sm:$0xff]   ;;  %vm3508_vm0 = vmmov 0   ;;  %v3509_v11 = vmov 2  }
  0x50   : > { %2788 = vmatprep.subr.bf16.mxu0 %v3507_v2  ;;  %2808 = vmatprep.subr.bf16.mxu1 %v3507_v2  ;;  %v3238_v6 = vld [vmem:[#allocation2] sm:$0xff]   ;;  %v3240_v8 = vld [vmem:[#allocation2 + $0x8] sm:$0xff]   ;;  %v3242_v10 = vld [vmem:[#allocation2 + $0x10] sm:$0xff]   ;;  %v3510_v14 = vmov 3   ;;  %v3511_v17 = vmov 4   ;;  %v3512_v18 = vmov 5  }
  0x51   : > { %s4018_s8 = smov (!%p250_p12, %s2425_s8), 3  ;;  %2789 = vmatpush3.bf16.msra.mxu0 %v3237_v5  ;;  %2809 = vmatpush3.bf16.msra.mxu1 %v3238_v6  ;;  %v3243_v12 = vld [vmem:[#allocation2 + $0x58] sm:$0xff]   ;;  %v3245_v15 = vld [vmem:[#allocation2 + $0x60] sm:$0xff]   ;;  %v3247_v19 = vld [vmem:[#allocation2 + $0x68] sm:$0xff]   ;;  %v3513_v21 = vmov 6   ;;  %v3514_v24 = vmov 8  }
  0x52   : > { %s2426_s30 = sshll.u32 %s4018_s8, 3  ;;  %2790 = vmatprep.subr.bf16.mxu0 %v3507_v2  ;;  %2810 = vmatprep.subr.bf16.mxu1 %v3507_v2  ;;  %v3244_v13 = vld [vmem:[#allocation2 + $0x18] sm:$0xff]   ;;  %v3246_v16 = vld [vmem:[#allocation2 + $0x20] sm:$0xff]   ;;  %v3248_v20 = vld [vmem:[#allocation2 + $0x28] sm:$0xff]   ;;  %v3515_v27 = vmov 9   ;;  %v3516_v28 = vmov 7  }
  0x53   : > { %s253_s26 = scalar_lea.vmem %s3993_s0, %s2426_s30  ;;  %2804 = vmatprep.mubr.msk.bf16.mxu0 %vm3508_vm0, %v3507_v2  ;;  %2824 = vmatprep.mubr.msk.bf16.mxu1 %vm3508_vm0, %v3507_v2  ;;  %v3249_v22 = vld [vmem:[#allocation2 + $0x70] sm:$0xff]   ;;  %v3251_v25 = vld [vmem:[#allocation2 + $0x78] sm:$0xff]   ;;  %v3517_v29 = vmov 11   ;;  %v3518_v30 = vmov 10   ;;  %v3519_v31 = vmov 12   ;;  %v3520_v32 = vmov 13  }
  0x54   : > { %v3683_v3 = vld [vmem:[%s253_s26] sm:$0xff]  ;;  %v3685_v4 = vld [vmem:[%s253_s26 + $0x8] sm:$0xff]  ;;  %v3250_v23 = vld [vmem:[#allocation2 + $0x30] sm:$0xff]   ;;  %v3521_v33 = vmov 14   ;;  %v3522_v34 = vmov 15   ;;  %v3739_v38 = vand.u32 127, %v259_v35 }
  0x55   : > { %262 = vperm.xlu1 %3212, %v3683_v3   ;;  %291 = vperm.xlu0 %3211, %v3683_v3   ;;  %v3252_v26 = vld [vmem:[#allocation2 + $0x38] sm:$0xff]   ;;  %v3254_v41 = vld [vmem:[#allocation2 + $0xc0] sm:$0xff]   ;;  %v3523_v43 = vmov 1.0|1.0   ;;  %v3256_v44 = vld [vmem:[#allocation2 + $0xc8] sm:$0xff]   ;;  %s246_s12 = sand.u32 1, %s3491_s19  }
  0x56   : > { %2791 = vmatpush3.bf16.msra.mxu0 %v3239_v7  ;;  %2811 = vmatpush3.bf16.msra.mxu1 %v3240_v8  ;;  %v3253_v42 = vld [vmem:[#allocation2 + $0x80] sm:$0xff]   ;;  %v3255_v45 = vld [vmem:[#allocation2 + $0x88] sm:$0xff]   ;;  %v3258_v46 = vld [vmem:[#allocation2 + $0xd0] sm:$0xff]   ;;  %s2424_s13 = sshll.u32 %s246_s12, 4  ;;  %s2634_s7 = sshll.u32 %s3578_s22, 8 }
  0x57   : > { %2792 = vmatprep.subr.bf16.mxu0 %v3507_v2  ;;  %2812 = vmatprep.subr.bf16.mxu1 %v3507_v2  ;;  %v3257_v47 = vld [vmem:[#allocation2 + $0x90] sm:$0xff]   ;;  %v3260_v48 = vld [vmem:[#allocation2 + $0xd8] sm:$0xff]   ;;  %v3262_v50 = vld [vmem:[#allocation2 + $0xe0] sm:$0xff]   ;;  %s248_s16 = scalar_lea.vmem [#allocation7], %s2424_s13  ;;  %s3950_s8 = scalar_lea.hbm %s3998_s5, %s2634_s7 }
  0x58   : > { %v3259_v49 = vld [vmem:[#allocation2 + $0x98] sm:$0xff]   ;;  %v3261_v51 = vld [vmem:[#allocation2 + $0xa0] sm:$0xff]   ;;  %v3264_v52 = vld [vmem:[#allocation2 + $0xe8] sm:$0xff]   ;;  %s2332_s17 = sshll.u32 %s248_s16, 4  ;;  %s3952_s30 = scalar_lea.sflag [#allocation4], %s246_s12  ;;  %s3945_s17 = int_to_ptr.vmem [resolvable:$true] %s2332_s17 }
  0x59   : > { %265 = vperm.xlu1 %3212, %v3685_v4   ;;  %294 = vperm.xlu0 %3211, %v3685_v4   ;;  %v3263_v55 = vld [vmem:[#allocation2 + $0xa8] sm:$0xff]   ;;  %v3265_v56 = vld [vmem:[#allocation2 + $0xf0] sm:$0xff]   ;;  %v3267_v60 = vld [vmem:[#allocation2 + $0xf8] sm:$0xff]   ;;  %s3429_s22 = scalar_lea.vmem %s3945_s17, 256  ;;  %p4011_p1 = scmp.ne.s32.totalorder %s4002_s28, 0 }
  0x5a   : > { %2793 = vmatpush3.bf16.msra.mxu0 %v3241_v9  ;;  %2813 = vmatpush3.bf16.msra.mxu1 %v3242_v10  ;;  %v3266_v57 = vld [vmem:[#allocation2 + $0xb0] sm:$0xff]   ;;  %v3268_v61 = vld [vmem:[#allocation2 + $0xb8] sm:$0xff]   ;;  %v3270_v62 = vld [vmem:[#allocation2 + $0x140] sm:$0xff]   ;;  %p3430_p10 = scmp.ne.s32.totalorder %s3945_s17, %s3429_s22  ;;  %s3524_s10 = smov [#allocation7]  }
  0x5b   : > { %2794 = vmatprep.subr.bf16.mxu0 %v3507_v2  ;;  %2814 = vmatprep.subr.bf16.mxu1 %v3507_v2  ;;  %v3269_v63 = vld [vmem:[#allocation2 + $0x100] sm:$0xff]   ;;  %v3272_v0 = vld [vmem:[#allocation2 + $0x148] sm:$0xff]   ;;  %v3276_v5 = vld [vmem:[#allocation2 + $0x158] sm:$0xff]   ;;  %s3433_s25 = sshll.u32 %s3524_s10, 4  ;;  %s3434_s25 = int_to_ptr.vmem [resolvable:$false] %s3433_s25 }
  0x5c   : > { %v3271_v1 = vld [vmem:[#allocation2 + $0x108] sm:$0xff]   ;;  %v3275_v6 = vld [vmem:[#allocation2 + $0x118] sm:$0xff]   ;;  %v3278_v7 = vld [vmem:[#allocation2 + $0x160] sm:$0xff]   ;;  %p3431_p2 = pnand %p3430_p10, %p4011_p1  ;;  %s3435_s26 = scalar_lea.vmem %s3434_s25, 512 }
  0x5d   : > { %3214 = vset.pattern.permute.xlu1 %v3509_v11  ;;  %3213 = vset.pattern.permute.xlu0 %v3509_v11  ;;  %v3277_v9 = vld [vmem:[#allocation2 + $0x120] sm:$0xff]   ;;  %v3280_v10 = vld [vmem:[#allocation2 + $0x168] sm:$0xff]   ;;  %p3436_p4 = scmp.lt.s32.totalorder %s3945_s17, %s3434_s25  ;;  %p3437_p7 = scmp.lt.s32.totalorder %s3435_s26, %s3429_s22 }
  0x5e   : > { %502 = vperm.xlu1 %3214, %v3685_v4   ;;  %499 = vperm.xlu0 %3213, %v3683_v3   ;;  %v3279_v11 = vld [vmem:[#allocation2 + $0x128] sm:$0xff]   ;;  %p3432_p3 = pneg %p3431_p2 }
  0x5f   : > { %2795 = vmatpush3.bf16.msra.mxu0 %v3243_v12  ;;  %2815 = vmatpush3.bf16.msra.mxu1 %v3244_v13  ;;  %v3282_v13 = vld [vmem:[#allocation2 + $0x170] sm:$0xff]   ;;  %p3438_p8 = por %p3437_p7, %p3436_p4 }
  0x60   : > { %2796 = vmatprep.subr.bf16.mxu0 %v3507_v2  ;;  %2816 = vmatprep.subr.bf16.mxu1 %v3507_v2 }
  0x61   : > { %p3439_p11 = pnand %p3438_p8, %p3432_p3 }
  0x62   : > { %3215 = vset.pattern.permute.xlu1 %v3510_v14  ;;  %3216 = vset.pattern.permute.xlu0 %v3510_v14  ;;  %v3281_v14 = vld [vmem:[#allocation2 + $0x130] sm:$0xff]  }
  0x63   : > { %620 = vperm.xlu1 %3215, %v3683_v3   ;;  %623 = vperm.xlu0 %3216, %v3685_v4  }
  0x64   : > { %2797 = vmatpush3.bf16.msra.mxu0 %v3245_v15  ;;  %2817 = vmatpush3.bf16.msra.mxu1 %v3246_v16 }
  0x65   : > { %2798 = vmatprep.subr.bf16.mxu0 %v3507_v2  ;;  %2818 = vmatprep.subr.bf16.mxu1 %v3507_v2 }
  0x67   : > { %3217 = vset.pattern.permute.xlu1 %v3511_v17  ;;  %3218 = vset.pattern.permute.xlu0 %v3512_v18  ;;  %v3284_v17 = vld [vmem:[#allocation2 + $0x178] sm:$0xff]  }
  0x68   : > { %741 = vperm.xlu1 %3217, %v3683_v3   ;;  %862 = vperm.xlu0 %3218, %v3683_v3  }
  0x69   : > { %2799 = vmatpush3.bf16.msra.mxu0 %v3247_v19  ;;  %2819 = vmatpush3.bf16.msra.mxu1 %v3248_v20  ;;  %v3286_v19 = vld [vmem:[#allocation2 + $0x1c0] sm:$0xff]  }
  0x6a   : > { %2800 = vmatprep.subr.bf16.mxu0 %v3507_v2  ;;  %2820 = vmatprep.subr.bf16.mxu1 %v3507_v2  ;;  %v3285_v20 = vld [vmem:[#allocation2 + $0x180] sm:$0xff]  }
  0x6c   : > { %744 = vperm.xlu1 %3217, %v3685_v4   ;;  %3221 = vset.pattern.permute.xlu0 %v3513_v21 }
  0x6d   : > { %986 = vperm.xlu0 %3221, %v3685_v4   ;;  %2801 = vmatpush3.bf16.msra.mxu0 %v3249_v22  ;;  %v3287_v22 = vld [vmem:[#allocation2 + $0x188] sm:$0xff]  }
  0x6e   : > { %2821 = vmatpush3.bf16.msra.mxu1 %v3250_v23  ;;  %2802 = vmatprep.subr.bf16.mxu0 %v3507_v2  ;;  %v3290_v23 = vld [vmem:[#allocation2 + $0x1d0] sm:$0xff]  }
  0x6f   : > { %2822 = vmatprep.subr.bf16.mxu1 %v3507_v2 }
  0x70   : > { %3219 = vset.pattern.permute.xlu1 %v3512_v18  ;;  %v3283_v18 = vld [vmem:[#allocation2 + $0x138] sm:$0xff]  }
  0x71   : > { %865 = vperm.xlu1 %3219, %v3685_v4   ;;  %3223 = vset.pattern.permute.xlu0 %v3514_v24 }
  0x72   : > { %1225 = vperm.xlu0 %3223, %v3683_v3   ;;  %2803 = vmatpush3.bf16.msra.mxu0 %v3251_v25  ;;  %v3292_v25 = vld [vmem:[#allocation2 + $0x1d8] sm:$0xff]  }
  0x73   : > { %2823 = vmatpush3.bf16.msra.mxu1 %v3252_v26  ;;  %2828 = vmatprep.subr.bf16.mxu0 %v3507_v2  ;;  %v3291_v26 = vld [vmem:[#allocation2 + $0x198] sm:$0xff]  }
  0x74   : > { %2848 = vmatprep.subr.bf16.mxu1 %v3507_v2 }
  0x75   : > { %3220 = vset.pattern.permute.xlu1 %v3513_v21  ;;  %v3288_v21 = vld [vmem:[#allocation2 + $0x1c8] sm:$0xff]  }
  0x76   : > { %983 = vperm.xlu1 %3220, %v3683_v3   ;;  %3226 = vset.pattern.permute.xlu0 %v3515_v27 }
  0x77   : > { %1349 = vperm.xlu0 %3226, %v3685_v4  }
  0x7a   : > { %3222 = vset.pattern.permute.xlu1 %v3516_v28  ;;  %v3294_v28 = vld [vmem:[#allocation2 + $0x1e0] sm:$0xff]  }
  0x7b   : > { %1104 = vperm.xlu1 %3222, %v3683_v3   ;;  %3228 = vset.pattern.permute.xlu0 %v3517_v29 }
  0x7c   : > { %1588 = vperm.xlu0 %3228, %v3683_v3  }
  0x7f   : > { %1107 = vperm.xlu1 %3222, %v3685_v4  }
  0x80   : > { %3231 = vset.pattern.permute.xlu0 %v3519_v31 }
  0x81   : > { %1712 = vperm.xlu0 %3231, %v3685_v4  }
  0x83   : > { %3224 = vset.pattern.permute.xlu1 %v3514_v24  ;;  %v3289_v24 = vld [vmem:[#allocation2 + $0x190] sm:$0xff]  }
  0x84   : > { %1228 = vperm.xlu1 %3224, %v3685_v4  }
  0x85   : > { %3233 = vset.pattern.permute.xlu0 %v3521_v33 }
  0x86   : > { %1951 = vperm.xlu0 %3233, %v3683_v3  }
  0x88   : > { %3225 = vset.pattern.permute.xlu1 %v3515_v27 }
  0x89   : > { %1346 = vperm.xlu1 %3225, %v3683_v3  }
  0x8a   : > { %3236 = vset.pattern.permute.xlu0 %v3522_v34 }
  0x8b   : > { %2075 = vperm.xlu0 %3236, %v3685_v4  }
  0x8d   : > { %3227 = vset.pattern.permute.xlu1 %v3518_v30  ;;  %v3296_v30 = vld [vmem:[#allocation2 + $0x1e8] sm:$0xff]  }
  0x8e   : > { %1467 = vperm.xlu1 %3227, %v3683_v3  }
  0x92   : > { %1470 = vperm.xlu1 %3227, %v3685_v4  }
  0x96   : > { %3229 = vset.pattern.permute.xlu1 %v3517_v29  ;;  %v3293_v29 = vld [vmem:[#allocation2 + $0x1a0] sm:$0xff]  }
  0x97   : > { %1591 = vperm.xlu1 %3229, %v3685_v4  }
  0x9b   : > { %3230 = vset.pattern.permute.xlu1 %v3519_v31 }
  0x9c   : > { %1709 = vperm.xlu1 %3230, %v3683_v3  }
  0xa0   : > { %3232 = vset.pattern.permute.xlu1 %v3520_v32  ;;  %v3295_v32 = vld [vmem:[#allocation2 + $0x1a8] sm:$0xff]  }
  0xa1   : > { %1830 = vperm.xlu1 %3232, %v3683_v3  }
  0xa5   : > { %1833 = vperm.xlu1 %3232, %v3685_v4  }
  0xa9   : > { %3234 = vset.pattern.permute.xlu1 %v3521_v33  ;;  %v3298_v33 = vld [vmem:[#allocation2 + $0x1f0] sm:$0xff]  }
  0xaa   : > { %1954 = vperm.xlu1 %3234, %v3685_v4   ;;  %v3273_v4 = vld [vmem:[#allocation2 + $0x110] sm:$0xff]  }
  0xae   : > { %3235 = vset.pattern.permute.xlu1 %v3522_v34  ;;  %v3297_v34 = vld [vmem:[#allocation2 + $0x1b0] sm:$0xff]  }
  0xaf   : > { %2072 = vperm.xlu1 %3235, %v3683_v3   ;;  %v3274_v3 = vld [vmem:[#allocation2 + $0x150] sm:$0xff]  }
  0xd4   : > { %v263_v36 = vpop.permute.xlu1 %262  ;;  %v292_v37 = vpop.permute.xlu0 %291 }
  0xd5   : > { %vm267_vm1 = vcmp.eq.s32.totalorder %v3739_v38, %v263_v36  ;;  %vm296_vm4 = vcmp.eq.s32.totalorder %v3739_v38, %v292_v37  ;;  %v3300_v36 = vld [vmem:[#allocation2 + $0x1f8] sm:$0xff]  }
  0xd8   : > { %v266_v39 = vpop.permute.xlu1 %265  ;;  %v295_v40 = vpop.permute.xlu0 %294 }
  0xd9   : > { %vm268_vm2 = vcmp.eq.s32.totalorder %v3739_v38, %v266_v39  ;;  %vm297_vm3 = vcmp.eq.s32.totalorder %v3739_v38, %v295_v40  ;;  %v3299_v39 = vld [vmem:[#allocation2 + $0x1b8] sm:$0xff]   ;;  %v3302_v40 = vld [vmem:[#allocation2 + $0x240] sm:$0xff]  }
  0xda   : > { %vm2449_vm5 = vmpackc.low %vm268_vm2, %vm267_vm1 }
  0xdb   : > { %vm2439_vm6 = vmpackc.low %vm297_vm3, %vm296_vm4  ;;  %2825 = vmatmul.mubr.msk.bf16.vlgmr.msra.gmra.mrb[0].mxu1 %vm2449_vm5, %v3523_v43 }
  0xdc   : > { %2805 = vmatmul.mubr.msk.bf16.vlgmr.msra.gmra.mrb[0].mxu0 %vm2439_vm6, %v3523_v43  ;;  %2849 = vmatpush3.bf16.msra.mxu1 %v3254_v41  ;;  %v3301_v41 = vld [vmem:[#allocation2 + $0x200] sm:$0xff]  }
  0xdd   : > { %2829 = vmatpush3.bf16.msra.mxu0 %v3253_v42  ;;  %2850 = vmatprep.subr.bf16.mxu1 %v3507_v2  ;;  %v503_v53 = vpop.permute.xlu1 %502  ;;  %v500_v54 = vpop.permute.xlu0 %499  ;;  %v3304_v42 = vld [vmem:[#allocation2 + $0x248] sm:$0xff]  }
  0xde   : > { %2830 = vmatprep.subr.bf16.mxu0 %v3507_v2  ;;  %2844 = vmatprep.mubr.msk.bf16.mxu0 %vm3508_vm0, %v3507_v2  ;;  %vm505_vm9 = vcmp.eq.s32.totalorder %v3739_v38, %v503_v53  ;;  %vm504_vm10 = vcmp.eq.s32.totalorder %v3739_v38, %v500_v54  ;;  %v3311_v54 = vld [vmem:[#allocation2 + $0x228] sm:$0xff]  }
  0xdf   : > { %2864 = vmatprep.mubr.msk.bf16.mxu1 %vm3508_vm0, %v3507_v2  ;;  %vm2461_vm12 = vmpackc.low %vm505_vm9, %vm504_vm10 }
  0xe0   : > { %2851 = vmatpush3.bf16.msra.mxu1 %v3256_v44  ;;  %v3303_v44 = vld [vmem:[#allocation2 + $0x208] sm:$0xff]  }
  0xe1   : > { %2831 = vmatpush3.bf16.msra.mxu0 %v3255_v45  ;;  %2852 = vmatprep.subr.bf16.mxu1 %v3507_v2  ;;  %v3306_v45 = vld [vmem:[#allocation2 + $0x250] sm:$0xff]  }
  0xe2   : > { %2832 = vmatprep.subr.bf16.mxu0 %v3507_v2  ;;  %v621_v58 = vpop.permute.xlu1 %620  ;;  %v624_v59 = vpop.permute.xlu0 %623 }
  0xe3   : > { %vm625_vm7 = vcmp.eq.s32.totalorder %v3739_v38, %v621_v58  ;;  %vm626_vm8 = vcmp.eq.s32.totalorder %v3739_v38, %v624_v59  ;;  %v3316_v59 = vld [vmem:[#allocation2 + $0x278] sm:$0xff]  }
  0xe4   : > { %2853 = vmatpush3.bf16.msra.mxu1 %v3258_v46  ;;  %vm2473_vm11 = vmpackc.low %vm626_vm8, %vm625_vm7  ;;  %v3305_v46 = vld [vmem:[#allocation2 + $0x210] sm:$0xff]  }
  0xe5   : > { %2833 = vmatpush3.bf16.msra.mxu0 %v3257_v47  ;;  %2854 = vmatprep.subr.bf16.mxu1 %v3507_v2  ;;  %v3308_v47 = vld [vmem:[#allocation2 + $0x258] sm:$0xff]  }
  0xe6   : > { %2834 = vmatprep.subr.bf16.mxu0 %v3507_v2 }
  0xe7   : > { %v742_v8 = vpop.permute.xlu1 %741  ;;  %v863_v16 = vpop.permute.xlu0 %862 }
  0xe8   : > { %2855 = vmatpush3.bf16.msra.mxu1 %v3260_v48  ;;  %vm867_vm14 = vcmp.eq.s32.totalorder %v3739_v38, %v863_v16  ;;  %vm746_vm15 = vcmp.eq.s32.totalorder %v3739_v38, %v742_v8  ;;  %v3307_v48 = vld [vmem:[#allocation2 + $0x218] sm:$0xff]   ;;  %v3325_v8 = vld [vmem:[#allocation2 + $0x2a0] sm:$0xff]  }
  0xe9   : > { %2835 = vmatpush3.bf16.msra.mxu0 %v3259_v49  ;;  %2856 = vmatprep.subr.bf16.mxu1 %v3507_v2  ;;  %v3310_v49 = vld [vmem:[#allocation2 + $0x260] sm:$0xff]   ;;  %v3332_v16 = vld [vmem:[#allocation2 + $0x2f8] sm:$0xff]  }
  0xea   : > { %2836 = vmatprep.subr.bf16.mxu0 %v3507_v2 }
  0xeb   : > { %v745_v12 = vpop.permute.xlu1 %744 }
  0xec   : > { %2857 = vmatpush3.bf16.msra.mxu1 %v3262_v50  ;;  %vm747_vm1 = vcmp.eq.s32.totalorder %v3739_v38, %v745_v12  ;;  %v987_v37 = vpop.permute.xlu0 %986  ;;  %v3309_v50 = vld [vmem:[#allocation2 + $0x220] sm:$0xff]   ;;  %v3330_v12 = vld [vmem:[#allocation2 + $0x2f0] sm:$0xff]  }
  0xed   : > { %2837 = vmatpush3.bf16.msra.mxu0 %v3261_v51  ;;  %2858 = vmatprep.subr.bf16.mxu1 %v3507_v2  ;;  %vm2485_vm3 = vmpackc.low %vm747_vm1, %vm746_vm15  ;;  %vm989_vm7 = vcmp.eq.s32.totalorder %v3739_v38, %v987_v37  ;;  %v3312_v51 = vld [vmem:[#allocation2 + $0x268] sm:$0xff]   ;;  %v3347_v37 = vld [vmem:[#allocation2 + $0x338] sm:$0xff]  }
  0xee   : > { %2838 = vmatprep.subr.bf16.mxu0 %v3507_v2 }
  0xf0   : > { %2859 = vmatpush3.bf16.msra.mxu1 %v3264_v52  ;;  %v866_v15 = vpop.permute.xlu1 %865 }
  0xf1   : > { %2839 = vmatpush3.bf16.msra.mxu0 %v3263_v55  ;;  %2860 = vmatprep.subr.bf16.mxu1 %v3507_v2  ;;  %vm868_vm13 = vcmp.eq.s32.totalorder %v3739_v38, %v866_v15  ;;  %v1226_v53 = vpop.permute.xlu0 %1225  ;;  %v3314_v55 = vld [vmem:[#allocation2 + $0x270] sm:$0xff]  }
  0xf2   : > { %2840 = vmatprep.subr.bf16.mxu0 %v3507_v2  ;;  %vm2497_vm2 = vmpackc.low %vm868_vm13, %vm867_vm14  ;;  %vm1230_vm13 = vcmp.eq.s32.totalorder %v3739_v38, %v1226_v53  ;;  %v3359_v53 = vld [vmem:[#allocation2 + $0x3a8] sm:$0xff]  }
  0xf4   : > { %2861 = vmatpush3.bf16.msra.mxu1 %v3265_v56  ;;  %v3313_v56 = vld [vmem:[#allocation2 + $0x230] sm:$0xff]  }
  0xf5   : > { %2841 = vmatpush3.bf16.msra.mxu0 %v3266_v57  ;;  %2862 = vmatprep.subr.bf16.mxu1 %v3507_v2  ;;  %v984_v27 = vpop.permute.xlu1 %983 }
  0xf6   : > { %2842 = vmatprep.subr.bf16.mxu0 %v3507_v2  ;;  %vm988_vm6 = vcmp.eq.s32.totalorder %v3739_v38, %v984_v27  ;;  %v1350_v58 = vpop.permute.xlu0 %1349  ;;  %v3342_v27 = vld [vmem:[#allocation2 + $0x360] sm:$0xff]  }
  0xf7   : > { %vm2509_vm9 = vmpackc.low %vm989_vm7, %vm988_vm6 }
  0xf8   : > { %2863 = vmatpush3.bf16.msra.mxu1 %v3267_v60  ;;  %v3315_v60 = vld [vmem:[#allocation2 + $0x238] sm:$0xff]  }
  0xf9   : > { %2843 = vmatpush3.bf16.msra.mxu0 %v3268_v61  ;;  %2888 = vmatprep.subr.bf16.mxu1 %v3507_v2  ;;  %v3318_v61 = vld [vmem:[#allocation2 + $0x2c0] sm:$0xff]  }
  0xfa   : > { %2868 = vmatprep.subr.bf16.mxu0 %v3507_v2  ;;  %v1105_v31 = vpop.permute.xlu1 %1104 }
  0xfb   : > { %2865 = vmatmul.mubr.msk.bf16.vlgmr.msra.gmra.mrb[4].mxu1 %vm2473_vm11, %v3523_v43  ;;  %vm1109_vm4 = vcmp.eq.s32.totalorder %v3739_v38, %v1105_v31  ;;  %vm1352_vm11 = vcmp.eq.s32.totalorder %v3739_v38, %v1350_v58  ;;  %v1589_v15 = vpop.permute.xlu0 %1588  ;;  %v3343_v31 = vld [vmem:[#allocation2 + $0x328] sm:$0xff]  }
  0xfc   : > { %2845 = vmatmul.mubr.msk.bf16.vlgmr.msra.gmra.mrb[4].mxu0 %vm2461_vm12, %v3523_v43  ;;  %2889 = vmatpush3.bf16.msra.mxu1 %v3270_v62  ;;  %v3317_v62 = vld [vmem:[#allocation2 + $0x280] sm:$0xff]  }
  0xfd   : > { %2869 = vmatpush3.bf16.msra.mxu0 %v3269_v63  ;;  %2890 = vmatprep.subr.bf16.mxu1 %v3507_v2  ;;  %v3320_v63 = vld [vmem:[#allocation2 + $0x2c8] sm:$0xff]  }
  0xfe   : > { %2870 = vmatprep.subr.bf16.mxu0 %v3507_v2  ;;  %2884 = vmatprep.mubr.msk.bf16.mxu0 %vm3508_vm0, %v3507_v2  ;;  %v1108_v35 = vpop.permute.xlu1 %1107 }
  0xff   : > { %2904 = vmatprep.mubr.msk.bf16.mxu1 %vm3508_vm0, %v3507_v2  ;;  %vm1110_vm5 = vcmp.eq.s32.totalorder %v3739_v38, %v1108_v35  ;;  %v3348_v35 = vld [vmem:[#allocation2 + $0x378] sm:$0xff]  }
 0x100   : > { %2891 = vmatpush3.bf16.msra.mxu1 %v3272_v0  ;;  %vm2521_vm8 = vmpackc.low %vm1110_vm5, %vm1109_vm4  ;;  %v3319_v0 = vld [vmem:[#allocation2 + $0x288] sm:$0xff]  }
 0x101   : > { %2871 = vmatpush3.bf16.msra.mxu0 %v3271_v1  ;;  %2892 = vmatprep.subr.bf16.mxu1 %v3507_v2  ;;  %v3322_v1 = vld [vmem:[#allocation2 + $0x2d0] sm:$0xff]  }
 0x102   : > { %2872 = vmatprep.subr.bf16.mxu0 %v3507_v2 }
 0x103   : > { %v1229_v52 = vpop.permute.xlu1 %1228 }
 0x104   : > { %2893 = vmatpush3.bf16.msra.mxu1 %v3274_v3  ;;  %vm1231_vm12 = vcmp.eq.s32.totalorder %v3739_v38, %v1229_v52  ;;  %v3321_v3 = vld [vmem:[#allocation2 + $0x290] sm:$0xff]  }
 0x105   : > { %2873 = vmatpush3.bf16.msra.mxu0 %v3273_v4  ;;  %2894 = vmatprep.subr.bf16.mxu1 %v3507_v2  ;;  %vm2533_vm15 = vmpackc.low %vm1231_vm12, %vm1230_vm13  ;;  %v3324_v4 = vld [vmem:[#allocation2 + $0x2d8] sm:$0xff]  }
 0x106   : > { %2874 = vmatprep.subr.bf16.mxu0 %v3507_v2 }
 0x108   : > { %2895 = vmatpush3.bf16.msra.mxu1 %v3276_v5  ;;  %v1347_v57 = vpop.permute.xlu1 %1346  ;;  %v3323_v5 = vld [vmem:[#allocation2 + $0x298] sm:$0xff]  }
 0x109   : > { %2875 = vmatpush3.bf16.msra.mxu0 %v3275_v6  ;;  %2896 = vmatprep.subr.bf16.mxu1 %v3507_v2  ;;  %vm1351_vm10 = vcmp.eq.s32.totalorder %v3739_v38, %v1347_v57  ;;  %v3326_v6 = vld [vmem:[#allocation2 + $0x2e0] sm:$0xff]  }
 0x10a   : > { %2876 = vmatprep.subr.bf16.mxu0 %v3507_v2  ;;  %vm2545_vm14 = vmpackc.low %vm1352_vm11, %vm1351_vm10 }
 0x10c   : > { %2897 = vmatpush3.bf16.msra.mxu1 %v3278_v7 }
 0x10d   : > { %2877 = vmatpush3.bf16.msra.mxu0 %v3277_v9  ;;  %2898 = vmatprep.subr.bf16.mxu1 %v3507_v2  ;;  %v1468_v7 = vpop.permute.xlu1 %1467  ;;  %v3328_v9 = vld [vmem:[#allocation2 + $0x2e8] sm:$0xff]  }
 0x10e   : > { %2878 = vmatprep.subr.bf16.mxu0 %v3507_v2 }
 0x110   : > { %2899 = vmatpush3.bf16.msra.mxu1 %v3280_v10  ;;  %v3327_v10 = vld [vmem:[#allocation2 + $0x2a8] sm:$0xff]  }
 0x111   : > { %2879 = vmatpush3.bf16.msra.mxu0 %v3279_v11  ;;  %2900 = vmatprep.subr.bf16.mxu1 %v3507_v2  ;;  %v1471_v11 = vpop.permute.xlu1 %1470 }
 0x112   : > { %2880 = vmatprep.subr.bf16.mxu0 %v3507_v2  ;;  %vm1473_vm4 = vcmp.eq.s32.totalorder %v3739_v38, %v1471_v11 }
 0x114   : > { %2901 = vmatpush3.bf16.msra.mxu1 %v3282_v13  ;;  %v3329_v13 = vld [vmem:[#allocation2 + $0x2b0] sm:$0xff]  }
 0x115   : > { %2881 = vmatpush3.bf16.msra.mxu0 %v3281_v14  ;;  %2902 = vmatprep.subr.bf16.mxu1 %v3507_v2 }
 0x116   : > { %2882 = vmatprep.subr.bf16.mxu0 %v3507_v2  ;;  %v1592_v14 = vpop.permute.xlu1 %1591 }
 0x117   : > { %vm1594_vm1 = vcmp.eq.s32.totalorder %v3739_v38, %v1592_v14 }
 0x118   : > { %2903 = vmatpush3.bf16.msra.mxu1 %v3284_v17  ;;  %v3331_v17 = vld [vmem:[#allocation2 + $0x2b8] sm:$0xff]  }
 0x119   : > { %2883 = vmatpush3.bf16.msra.mxu0 %v3283_v18  ;;  %2928 = vmatprep.subr.bf16.mxu1 %v3507_v2  ;;  %v3334_v18 = vld [vmem:[#allocation2 + $0x340] sm:$0xff]  }
 0x11a   : > { %2908 = vmatprep.subr.bf16.mxu0 %v3507_v2 }
 0x11b   : > { %2905 = vmatmul.mubr.msk.bf16.vlgmr.msra.gmra.mrb[8].mxu1 %vm2497_vm2, %v3523_v43  ;;  %vm1593_vm2 = vcmp.eq.s32.totalorder %v3739_v38, %v1589_v15 }
 0x11c   : > { %2885 = vmatmul.mubr.msk.bf16.vlgmr.msra.gmra.mrb[8].mxu0 %vm2485_vm3, %v3523_v43  ;;  %2929 = vmatpush3.bf16.msra.mxu1 %v3286_v19  ;;  %vm1472_vm3 = vcmp.eq.s32.totalorder %v3739_v38, %v1468_v7  ;;  %vm2569_vm5 = vmpackc.low %vm1594_vm1, %vm1593_vm2  ;;  %v3333_v19 = vld [vmem:[#allocation2 + $0x300] sm:$0xff]  }
 0x11d   : > { %2909 = vmatpush3.bf16.msra.mxu0 %v3285_v20  ;;  %2930 = vmatprep.subr.bf16.mxu1 %v3507_v2  ;;  %vm2557_vm6 = vmpackc.low %vm1473_vm4, %vm1472_vm3  ;;  %v3336_v20 = vld [vmem:[#allocation2 + $0x348] sm:$0xff]  }
 0x11e   : > { %2910 = vmatprep.subr.bf16.mxu0 %v3507_v2  ;;  %2924 = vmatprep.mubr.msk.bf16.mxu0 %vm3508_vm0, %v3507_v2 }
 0x11f   : > { %2944 = vmatprep.mubr.msk.bf16.mxu1 %vm3508_vm0, %v3507_v2 }
 0x120   : > { %2931 = vmatpush3.bf16.msra.mxu1 %v3288_v21  ;;  %v3335_v21 = vld [vmem:[#allocation2 + $0x308] sm:$0xff]  }
 0x121   : > { %2911 = vmatpush3.bf16.msra.mxu0 %v3287_v22  ;;  %2932 = vmatprep.subr.bf16.mxu1 %v3507_v2  ;;  %v3338_v22 = vld [vmem:[#allocation2 + $0x350] sm:$0xff]  }
 0x122   : > { %2912 = vmatprep.subr.bf16.mxu0 %v3507_v2 }
 0x124   : > { %2933 = vmatpush3.bf16.msra.mxu1 %v3290_v23  ;;  %v3337_v23 = vld [vmem:[#allocation2 + $0x310] sm:$0xff]  }
 0x125   : > { %2913 = vmatpush3.bf16.msra.mxu0 %v3289_v24  ;;  %2934 = vmatprep.subr.bf16.mxu1 %v3507_v2  ;;  %v3340_v24 = vld [vmem:[#allocation2 + $0x358] sm:$0xff]  }
 0x126   : > { %2914 = vmatprep.subr.bf16.mxu0 %v3507_v2 }
 0x128   : > { %2935 = vmatpush3.bf16.msra.mxu1 %v3292_v25  ;;  %v3339_v25 = vld [vmem:[#allocation2 + $0x318] sm:$0xff]  }
 0x129   : > { %2915 = vmatpush3.bf16.msra.mxu0 %v3291_v26  ;;  %2936 = vmatprep.subr.bf16.mxu1 %v3507_v2  ;;  %v1710_v26 = vpop.permute.xlu1 %1709 }
 0x12a   : > { %2916 = vmatprep.subr.bf16.mxu0 %v3507_v2 }
 0x12c   : > { %2937 = vmatpush3.bf16.msra.mxu1 %v3294_v28  ;;  %v3341_v28 = vld [vmem:[#allocation2 + $0x320] sm:$0xff]  }
 0x12d   : > { %2917 = vmatpush3.bf16.msra.mxu0 %v3293_v29  ;;  %2938 = vmatprep.subr.bf16.mxu1 %v3507_v2  ;;  %v3344_v29 = vld [vmem:[#allocation2 + $0x368] sm:$0xff]  }
 0x12e   : > { %2918 = vmatprep.subr.bf16.mxu0 %v3507_v2 }
 0x130   : > { %2939 = vmatpush3.bf16.msra.mxu1 %v3296_v30  ;;  %v1831_v30 = vpop.permute.xlu1 %1830 }
 0x131   : > { %2919 = vmatpush3.bf16.msra.mxu0 %v3295_v32  ;;  %2940 = vmatprep.subr.bf16.mxu1 %v3507_v2  ;;  %v3346_v32 = vld [vmem:[#allocation2 + $0x370] sm:$0xff]   ;;  %vm1835_vm7 = vcmp.eq.s32.totalorder %v3739_v38, %v1831_v30  ;;  %v3366_v30 = vld [vmem:[#allocation5 + $0x8] sm:$0xff]  }
 0x132   : > { %2920 = vmatprep.subr.bf16.mxu0 %v3507_v2 }
 0x134   : > { %2941 = vmatpush3.bf16.msra.mxu1 %v3298_v33  ;;  %v3345_v33 = vld [vmem:[#allocation2 + $0x330] sm:$0xff]  }
 0x135   : > { %2921 = vmatpush3.bf16.msra.mxu0 %v3297_v34  ;;  %2942 = vmatprep.subr.bf16.mxu1 %v3507_v2  ;;  %v1834_v34 = vpop.permute.xlu1 %1833 }
 0x136   : > { %2922 = vmatprep.subr.bf16.mxu0 %v3507_v2 }
 0x138   : > { %2943 = vmatpush3.bf16.msra.mxu1 %v3300_v36  ;;  %v1713_v36 = vpop.permute.xlu0 %1712 }
 0x139   : > { %2923 = vmatpush3.bf16.msra.mxu0 %v3299_v39  ;;  %2968 = vmatprep.subr.bf16.mxu1 %v3507_v2  ;;  %vm1715_vm10 = vcmp.eq.s32.totalorder %v3739_v38, %v1713_v36  ;;  %v3350_v39 = vld [vmem:[#allocation2 + $0x3c0] sm:$0xff]  }
 0x13a   : > { %2948 = vmatprep.subr.bf16.mxu0 %v3507_v2 }
 0x13b   : > { %2945 = vmatmul.mubr.msk.bf16.vlgmr.msra.gmra.mrb[12].mxu1 %vm2521_vm8, %v3523_v43  ;;  %vm1836_vm8 = vcmp.eq.s32.totalorder %v3739_v38, %v1834_v34 }
 0x13c   : > { %2925 = vmatmul.mubr.msk.bf16.vlgmr.msra.gmra.mrb[12].mxu0 %vm2509_vm9, %v3523_v43  ;;  %2969 = vmatpush3.bf16.msra.mxu1 %v3302_v40  ;;  %vm1714_vm9 = vcmp.eq.s32.totalorder %v3739_v38, %v1710_v26  ;;  %vm2593_vm11 = vmpackc.low %vm1836_vm8, %vm1835_vm7  ;;  %v3349_v40 = vld [vmem:[#allocation2 + $0x380] sm:$0xff]   ;;  %v1952_v52 = vpop.permute.xlu0 %1951 }
 0x13d   : > { %2949 = vmatpush3.bf16.msra.mxu0 %v3301_v41  ;;  %2970 = vmatprep.subr.bf16.mxu1 %v3507_v2  ;;  %vm2581_vm12 = vmpackc.low %vm1715_vm10, %vm1714_vm9  ;;  %v3352_v41 = vld [vmem:[#allocation2 + $0x3c8] sm:$0xff]   ;;  %vm1956_vm1 = vcmp.eq.s32.totalorder %v3739_v38, %v1952_v52 }
 0x13e   : > { %2950 = vmatprep.subr.bf16.mxu0 %v3507_v2  ;;  %2964 = vmatprep.mubr.msk.bf16.mxu0 %vm3508_vm0, %v3507_v2 }
 0x13f   : > { %2984 = vmatprep.mubr.msk.bf16.mxu1 %vm3508_vm0, %v3507_v2 }
 0x140   : > { %2971 = vmatpush3.bf16.msra.mxu1 %v3304_v42  ;;  %v3351_v42 = vld [vmem:[#allocation2 + $0x388] sm:$0xff]  }
 0x141   : > { %2951 = vmatpush3.bf16.msra.mxu0 %v3303_v44  ;;  %2972 = vmatprep.subr.bf16.mxu1 %v3507_v2  ;;  %v3354_v44 = vld [vmem:[#allocation2 + $0x3d0] sm:$0xff]  }
 0x142   : > { %2952 = vmatprep.subr.bf16.mxu0 %v3507_v2 }
 0x144   : > { %2973 = vmatpush3.bf16.msra.mxu1 %v3306_v45  ;;  %v3353_v45 = vld [vmem:[#allocation2 + $0x390] sm:$0xff]  }
 0x145   : > { %2953 = vmatpush3.bf16.msra.mxu0 %v3305_v46  ;;  %2974 = vmatprep.subr.bf16.mxu1 %v3507_v2  ;;  %v3356_v46 = vld [vmem:[#allocation2 + $0x3d8] sm:$0xff]  }
 0x146   : > { %2954 = vmatprep.subr.bf16.mxu0 %v3507_v2 }
 0x148   : > { %2975 = vmatpush3.bf16.msra.mxu1 %v3308_v47  ;;  %v3355_v47 = vld [vmem:[#allocation2 + $0x398] sm:$0xff]  }
 0x149   : > { %2955 = vmatpush3.bf16.msra.mxu0 %v3307_v48  ;;  %2976 = vmatprep.subr.bf16.mxu1 %v3507_v2  ;;  %v3358_v48 = vld [vmem:[#allocation2 + $0x3e0] sm:$0xff]  }
 0x14a   : > { %2956 = vmatprep.subr.bf16.mxu0 %v3507_v2 }
 0x14c   : > { %2977 = vmatpush3.bf16.msra.mxu1 %v3310_v49  ;;  %v1955_v49 = vpop.permute.xlu1 %1954 }
 0x14d   : > { %2957 = vmatpush3.bf16.msra.mxu0 %v3309_v50  ;;  %2978 = vmatprep.subr.bf16.mxu1 %v3507_v2  ;;  %v3357_v50 = vld [vmem:[#allocation2 + $0x3a0] sm:$0xff]  }
 0x14e   : > { %2958 = vmatprep.subr.bf16.mxu0 %v3507_v2 }
 0x150   : > { %2979 = vmatpush3.bf16.msra.mxu1 %v3312_v51  ;;  %v3360_v51 = vld [vmem:[#allocation2 + $0x3e8] sm:$0xff]  }
 0x151   : > { %2959 = vmatpush3.bf16.msra.mxu0 %v3311_v54  ;;  %2980 = vmatprep.subr.bf16.mxu1 %v3507_v2 }
 0x152   : > { %2960 = vmatprep.subr.bf16.mxu0 %v3507_v2 }
 0x154   : > { %2981 = vmatpush3.bf16.msra.mxu1 %v3314_v55  ;;  %v2073_v55 = vpop.permute.xlu1 %2072 }
 0x155   : > { %2961 = vmatpush3.bf16.msra.mxu0 %v3313_v56  ;;  %2982 = vmatprep.subr.bf16.mxu1 %v3507_v2  ;;  %vm2077_vm13 = vcmp.eq.s32.totalorder %v3739_v38, %v2073_v55 }
 0x156   : > { %2962 = vmatprep.subr.bf16.mxu0 %v3507_v2 }
 0x158   : > { %2983 = vmatpush3.bf16.msra.mxu1 %v3316_v59 }
 0x159   : > { %2963 = vmatpush3.bf16.msra.mxu0 %v3315_v60  ;;  %3008 = vmatprep.subr.bf16.mxu1 %v3507_v2 }
 0x15a   : > { %2988 = vmatprep.subr.bf16.mxu0 %v3507_v2 }
 0x15b   : > { %2985 = vmatmul.mubr.msk.bf16.vlgmr.msra.gmra.mrb[16].mxu1 %vm2545_vm14, %v3523_v43 }
 0x15c   : > { %2965 = vmatmul.mubr.msk.bf16.vlgmr.msra.gmra.mrb[16].mxu0 %vm2533_vm15, %v3523_v43  ;;  %3009 = vmatpush3.bf16.msra.mxu1 %v3318_v61  ;;  %v3362_v61 = vld [vmem:[#allocation2 + $0x3f0] sm:$0xff]   ;;  %vm1957_vm15 = vcmp.eq.s32.totalorder %v3739_v38, %v1955_v49 }
 0x15d   : > { %2989 = vmatpush3.bf16.msra.mxu0 %v3317_v62  ;;  %3010 = vmatprep.subr.bf16.mxu1 %v3507_v2  ;;  %vm2605_vm3 = vmpackc.low %vm1957_vm15, %vm1956_vm1 }
 0x15e   : > { %2990 = vmatprep.subr.bf16.mxu0 %v3507_v2  ;;  %3004 = vmatprep.mubr.msk.bf16.mxu0 %vm3508_vm0, %v3507_v2 }
 0x15f   : > { %3024 = vmatprep.mubr.msk.bf16.mxu1 %vm3508_vm0, %v3507_v2 }
 0x160   : > { %3011 = vmatpush3.bf16.msra.mxu1 %v3320_v63 }
 0x161   : > { %2991 = vmatpush3.bf16.msra.mxu0 %v3319_v0  ;;  %3012 = vmatprep.subr.bf16.mxu1 %v3507_v2  ;;  %v3361_v0 = vld [vmem:[#allocation2 + $0x3b0] sm:$0xff]  }
 0x162   : > { %2992 = vmatprep.subr.bf16.mxu0 %v3507_v2 }
 0x164   : > { %3013 = vmatpush3.bf16.msra.mxu1 %v3322_v1 }
 0x165   : > { %2993 = vmatpush3.bf16.msra.mxu0 %v3321_v3  ;;  %3014 = vmatprep.subr.bf16.mxu1 %v3507_v2 }
 0x166   : > { %2994 = vmatprep.subr.bf16.mxu0 %v3507_v2 }
 0x168   : > { %3015 = vmatpush3.bf16.msra.mxu1 %v3324_v4  ;;  %v2076_v4 = vpop.permute.xlu0 %2075 }
 0x169   : > { %2995 = vmatpush3.bf16.msra.mxu0 %v3323_v5  ;;  %3016 = vmatprep.subr.bf16.mxu1 %v3507_v2  ;;  %v3364_v5 = vld [vmem:[#allocation2 + $0x3f8] sm:$0xff]   ;;  %vm2078_vm14 = vcmp.eq.s32.totalorder %v3739_v38, %v2076_v4 }
 0x16a   : > { %2996 = vmatprep.subr.bf16.mxu0 %v3507_v2  ;;  %vm2617_vm2 = vmpackc.low %vm2078_vm14, %vm2077_vm13 }
 0x16c   : > { %3017 = vmatpush3.bf16.msra.mxu1 %v3326_v6  ;;  %v3363_v6 = vld [vmem:[#allocation2 + $0x3b8] sm:$0xff]  }
 0x16d   : > { %2997 = vmatpush3.bf16.msra.mxu0 %v3325_v8  ;;  %3018 = vmatprep.subr.bf16.mxu1 %v3507_v2 }
 0x16e   : > { %2998 = vmatprep.subr.bf16.mxu0 %v3507_v2 }
 0x170   : > { %3019 = vmatpush3.bf16.msra.mxu1 %v3328_v9 }
 0x171   : > { %2999 = vmatpush3.bf16.msra.mxu0 %v3327_v10  ;;  %3020 = vmatprep.subr.bf16.mxu1 %v3507_v2 }
 0x172   : > { %3000 = vmatprep.subr.bf16.mxu0 %v3507_v2 }
 0x174   : > { %3021 = vmatpush3.bf16.msra.mxu1 %v3330_v12 }
 0x175   : > { %3001 = vmatpush3.bf16.msra.mxu0 %v3329_v13  ;;  %3022 = vmatprep.subr.bf16.mxu1 %v3507_v2 }
 0x176   : > { %3002 = vmatprep.subr.bf16.mxu0 %v3507_v2 }
 0x178   : > { %3023 = vmatpush3.bf16.msra.mxu1 %v3332_v16 }
 0x179   : > { %3003 = vmatpush3.bf16.msra.mxu0 %v3331_v17  ;;  %3048 = vmatprep.subr.bf16.mxu1 %v3507_v2 }
 0x17a   : > { %3028 = vmatprep.subr.bf16.mxu0 %v3507_v2 }
 0x17b   : > { %3025 = vmatmul.mubr.msk.bf16.vlgmr.msra.gmra.mrb[20].mxu1 %vm2569_vm5, %v3523_v43 }
 0x17c   : > { %3005 = vmatmul.mubr.msk.bf16.vlgmr.msra.gmra.mrb[20].mxu0 %vm2557_vm6, %v3523_v43  ;;  %3049 = vmatpush3.bf16.msra.mxu1 %v3334_v18 }
 0x17d   : > { %3029 = vmatpush3.bf16.msra.mxu0 %v3333_v19  ;;  %3050 = vmatprep.subr.bf16.mxu1 %v3507_v2 }
 0x17e   : > { %3030 = vmatprep.subr.bf16.mxu0 %v3507_v2  ;;  %3044 = vmatprep.mubr.msk.bf16.mxu0 %vm3508_vm0, %v3507_v2 }
 0x17f   : > { %3064 = vmatprep.mubr.msk.bf16.mxu1 %vm3508_vm0, %v3507_v2 }
 0x180   : > { %3051 = vmatpush3.bf16.msra.mxu1 %v3336_v20 }
 0x181   : > { %3031 = vmatpush3.bf16.msra.mxu0 %v3335_v21  ;;  %3052 = vmatprep.subr.bf16.mxu1 %v3507_v2 }
 0x182   : > { %3032 = vmatprep.subr.bf16.mxu0 %v3507_v2 }
 0x184   : > { %3053 = vmatpush3.bf16.msra.mxu1 %v3338_v22 }
 0x185   : > { %3033 = vmatpush3.bf16.msra.mxu0 %v3337_v23  ;;  %3054 = vmatprep.subr.bf16.mxu1 %v3507_v2 }
 0x186   : > { %3034 = vmatprep.subr.bf16.mxu0 %v3507_v2 }
 0x188   : > { %3055 = vmatpush3.bf16.msra.mxu1 %v3340_v24 }
 0x189   : > { %3035 = vmatpush3.bf16.msra.mxu0 %v3339_v25  ;;  %3056 = vmatprep.subr.bf16.mxu1 %v3507_v2 }
 0x18a   : > { %3036 = vmatprep.subr.bf16.mxu0 %v3507_v2 }
 0x18c   : > { %3057 = vmatpush3.bf16.msra.mxu1 %v3342_v27 }
 0x18d   : > { %3037 = vmatpush3.bf16.msra.mxu0 %v3341_v28  ;;  %3058 = vmatprep.subr.bf16.mxu1 %v3507_v2 }
 0x18e   : > { %3038 = vmatprep.subr.bf16.mxu0 %v3507_v2 }
 0x190   : > { %3059 = vmatpush3.bf16.msra.mxu1 %v3344_v29  ;;  %v3365_v29 = vld [vmem:[#allocation5] sm:$0xff]  }
 0x191   : > { %3039 = vmatpush3.bf16.msra.mxu0 %v3343_v31  ;;  %3060 = vmatprep.subr.bf16.mxu1 %v3507_v2  ;;  %v3367_v31 = vld [vmem:[#allocation5 + $0x10] sm:$0xff]  }
 0x192   : > { %3040 = vmatprep.subr.bf16.mxu0 %v3507_v2 }
 0x194   : > { %3061 = vmatpush3.bf16.msra.mxu1 %v3346_v32  ;;  %v3368_v32 = vld [vmem:[#allocation5 + $0x18] sm:$0xff]  }
 0x195   : > { %3041 = vmatpush3.bf16.msra.mxu0 %v3345_v33  ;;  %3062 = vmatprep.subr.bf16.mxu1 %v3507_v2  ;;  %v3369_v33 = vld [vmem:[#allocation5 + $0x20] sm:$0xff]  }
 0x196   : > { %3042 = vmatprep.subr.bf16.mxu0 %v3507_v2 }
 0x198   : > { %3063 = vmatpush3.bf16.msra.mxu1 %v3348_v35 }
 0x199   : > { %3043 = vmatpush3.bf16.msra.mxu0 %v3347_v37  ;;  %3088 = vmatprep.subr.bf16.mxu1 %v3507_v2  ;;  %v3370_v37 = vld [vmem:[#allocation5 + $0x28] sm:$0xff]  }
 0x19a   : > { %3068 = vmatprep.subr.bf16.mxu0 %v3507_v2 }
 0x19b   : > { %3065 = vmatmul.mubr.msk.bf16.vlgmr.msra.gmra.mrb[24].mxu1 %vm2593_vm11, %v3523_v43 }
 0x19c   : > { %3045 = vmatmul.mubr.msk.bf16.vlgmr.msra.gmra.mrb[24].mxu0 %vm2581_vm12, %v3523_v43  ;;  %3089 = vmatpush3.bf16.msra.mxu1 %v3350_v39 }
 0x19d   : > { %3069 = vmatpush3.bf16.msra.mxu0 %v3349_v40  ;;  %3090 = vmatprep.subr.bf16.mxu1 %v3507_v2 }
 0x19e   : > { %3070 = vmatprep.subr.bf16.mxu0 %v3507_v2  ;;  %3084 = vmatprep.mubr.msk.bf16.mxu0 %vm3508_vm0, %v3507_v2 }
 0x19f   : > { %3104 = vmatprep.mubr.msk.bf16.mxu1 %vm3508_vm0, %v3507_v2 }
 0x1a0   : > { %3091 = vmatpush3.bf16.msra.mxu1 %v3352_v41 }
 0x1a1   : > { %3071 = vmatpush3.bf16.msra.mxu0 %v3351_v42  ;;  %3092 = vmatprep.subr.bf16.mxu1 %v3507_v2 }
 0x1a2   : > { %3072 = vmatprep.subr.bf16.mxu0 %v3507_v2 }
 0x1a4   : > { %3093 = vmatpush3.bf16.msra.mxu1 %v3354_v44 }
 0x1a5   : > { %3073 = vmatpush3.bf16.msra.mxu0 %v3353_v45  ;;  %3094 = vmatprep.subr.bf16.mxu1 %v3507_v2 }
 0x1a6   : > { %3074 = vmatprep.subr.bf16.mxu0 %v3507_v2 }
 0x1a8   : > { %3095 = vmatpush3.bf16.msra.mxu1 %v3356_v46 }
 0x1a9   : > { %3075 = vmatpush3.bf16.msra.mxu0 %v3355_v47  ;;  %3096 = vmatprep.subr.bf16.mxu1 %v3507_v2 }
 0x1aa   : > { %3076 = vmatprep.subr.bf16.mxu0 %v3507_v2 }
 0x1ac   : > { %3097 = vmatpush3.bf16.msra.mxu1 %v3358_v48  ;;  %v3371_v48 = vld [vmem:[#allocation5 + $0x30] sm:$0xff]  }
 0x1ad   : > { %3077 = vmatpush3.bf16.msra.mxu0 %v3357_v50  ;;  %3098 = vmatprep.subr.bf16.mxu1 %v3507_v2  ;;  %v3372_v50 = vld [vmem:[#allocation5 + $0x38] sm:$0xff]  }
 0x1ae   : > { %v491_v54 = vpop.f32.mrb[0].mxu1  ;;  %3078 = vmatprep.subr.bf16.mxu0 %v3507_v2 }
 0x1af   : > { %v402_v56 = vpop.f32.mrb[0].mxu0  ;;  %v2826_v57 = vpop.f32.mrb[1].mxu1 }
 0x1b0   : > { %v492_v58 = vadd.f32 %v491_v54, %v402_v56  ;;  %v2806_v59 = vpop.f32.mrb[1].mxu0  ;;  %3099 = vmatpush3.bf16.msra.mxu1 %v3360_v51  ;;  %v494_v60 = vpop.f32.mrb[2].mxu1 }
 0x1b1   : > { %3079 = vmatpush3.bf16.msra.mxu0 %v3359_v53  ;;  %v405_v62 = vpop.f32.mrb[2].mxu0  ;;  %v2827_v63 = vpop.f32.mrb[3].mxu1  ;;  %3100 = vmatprep.subr.bf16.mxu1 %v3507_v2 }
 0x1b2   : > { %v495_v1 = vadd.f32 %v494_v60, %v405_v62  ;;  %v2807_v3 = vpop.f32.mrb[3].mxu0  ;;  %3080 = vmatprep.subr.bf16.mxu0 %v3507_v2 }
 0x1b4   : > { %3101 = vmatpush3.bf16.msra.mxu1 %v3362_v61 }
 0x1b5   : > { %3081 = vmatpush3.bf16.msra.mxu0 %v3361_v0  ;;  %3102 = vmatprep.subr.bf16.mxu1 %v3507_v2 }
 0x1b6   : > { %3082 = vmatprep.subr.bf16.mxu0 %v3507_v2 }
 0x1b8   : > { %3103 = vmatpush3.bf16.msra.mxu1 %v3364_v5 }
 0x1b9   : > { %3083 = vmatpush3.bf16.msra.mxu0 %v3363_v6 }
 0x1ba   : > { %3108 = vmatprep.subr.bf16.mxu0 %v3507_v2 }
 0x1bb   : > { %3105 = vmatmul.mubr.msk.bf16.vlgmr.msra.gmra.mrb[28].mxu1 %vm2617_vm2, %v3523_v43 }
 0x1bc   : > { %3085 = vmatmul.mubr.msk.bf16.vlgmr.msra.gmra.mrb[28].mxu0 %vm2605_vm3, %v3523_v43 }
 0x1bd   : > { %3124 = vmatprep.mubr.msk.bf16.mxu0 %vm3508_vm0, %v3507_v2  ;;  %3109 = vmatpush3.bf16.msra.mxu0 %v3365_v29 }
 0x1be   : > { %3110 = vmatprep.subr.bf16.mxu0 %v3507_v2 }
 0x1c1   : > { %3111 = vmatpush3.bf16.msra.mxu0 %v3366_v30 }
 0x1c2   : > { %3112 = vmatprep.subr.bf16.mxu0 %v3507_v2 }
 0x1c5   : > { %3113 = vmatpush3.bf16.msra.mxu0 %v3367_v31 }
 0x1c6   : > { %3114 = vmatprep.subr.bf16.mxu0 %v3507_v2 }
 0x1c9   : > { %3115 = vmatpush3.bf16.msra.mxu0 %v3368_v32 }
 0x1ca   : > { %3116 = vmatprep.subr.bf16.mxu0 %v3507_v2 }
 0x1cd   : > { %3117 = vmatpush3.bf16.msra.mxu0 %v3369_v33 }
 0x1ce   : > { %v731_v7 = vpop.f32.mrb[4].mxu1  ;;  %3118 = vmatprep.subr.bf16.mxu0 %v3507_v2 }
 0x1cf   : > { %v610_v8 = vpop.f32.mrb[4].mxu0  ;;  %v2866_v9 = vpop.f32.mrb[5].mxu1 }
 0x1d0   : > { %v617_v10 = vadd.f32 %v610_v8, %v492_v58  ;;  %v2846_v11 = vpop.f32.mrb[5].mxu0  ;;  %v734_v12 = vpop.f32.mrb[6].mxu1 }
 0x1d1   : > { %v613_v38 = vpop.f32.mrb[6].mxu0  ;;  %v2867_v13 = vpop.f32.mrb[7].mxu1  ;;  %3119 = vmatpush3.bf16.msra.mxu0 %v3370_v37 }
 0x1d2   : > { %v738_v14 = vadd.f32 %v731_v7, %v617_v10  ;;  %v618_v15 = vadd.f32 %v613_v38, %v495_v1  ;;  %v2847_v16 = vpop.f32.mrb[7].mxu0  ;;  %3120 = vmatprep.subr.bf16.mxu0 %v3507_v2 }
 0x1d4   : > { %v739_v17 = vadd.f32 %v734_v12, %v618_v15 }
 0x1d5   : > { %3121 = vmatpush3.bf16.msra.mxu0 %v3371_v48 }
 0x1d6   : > { %3122 = vmatprep.subr.bf16.mxu0 %v3507_v2 }
 0x1d9   : > { %3123 = vmatpush3.bf16.msra.mxu0 %v3372_v50 }
 0x1ee   : > { %v973_v18 = vpop.f32.mrb[8].mxu1 }
 0x1ef   : > { %v852_v19 = vpop.f32.mrb[8].mxu0  ;;  %v2906_v20 = vpop.f32.mrb[9].mxu1 }
 0x1f0   : > { %v859_v21 = vadd.f32 %v852_v19, %v738_v14  ;;  %v2886_v43 = vpop.f32.mrb[9].mxu0  ;;  %v976_v22 = vpop.f32.mrb[10].mxu1 }
 0x1f1   : > { %v855_v23 = vpop.f32.mrb[10].mxu0  ;;  %v2907_v24 = vpop.f32.mrb[11].mxu1 }
 0x1f2   : > { %v980_v25 = vadd.f32 %v973_v18, %v859_v21  ;;  %v860_v26 = vadd.f32 %v855_v23, %v739_v17  ;;  %v2887_v27 = vpop.f32.mrb[11].mxu0 }
 0x1f3   : > { %v2619_v27 = vld [vmem:[%s3995_s2] ss:$0 sm:$0xff] }
 0x1f4   : > { %v981_v28 = vadd.f32 %v976_v22, %v860_v26 }
 0x20e   : > { %v1215_v34 = vpop.f32.mrb[12].mxu1 }
 0x20f   : > { %v1094_v35 = vpop.f32.mrb[12].mxu0  ;;  %v2946_v36 = vpop.f32.mrb[13].mxu1 }
 0x210   : > { %v1101_v39 = vadd.f32 %v1094_v35, %v980_v25  ;;  %v2926_v40 = vpop.f32.mrb[13].mxu0  ;;  %v1218_v41 = vpop.f32.mrb[14].mxu1 }
 0x211   : > { %v1097_v42 = vpop.f32.mrb[14].mxu0  ;;  %v2947_v44 = vpop.f32.mrb[15].mxu1  ;;  %v2620_v40 = vld [vmem:[%s3997_s4] ss:$0 sm:$0xff] }
 0x212   : > { %v1222_v45 = vadd.f32 %v1215_v34, %v1101_v39  ;;  %v1102_v46 = vadd.f32 %v1097_v42, %v981_v28  ;;  %v2927_v47 = vpop.f32.mrb[15].mxu0 }
 0x214   : > { %v1223_v49 = vadd.f32 %v1218_v41, %v1102_v46 }
 0x22e   : > { %v1457_v51 = vpop.f32.mrb[16].mxu1 }
 0x22f   : > { %v1336_v52 = vpop.f32.mrb[16].mxu0  ;;  %v2986_v53 = vpop.f32.mrb[17].mxu1 }
 0x230   : > { %v1343_v54 = vadd.f32 %v1336_v52, %v1222_v45  ;;  %v2966_v55 = vpop.f32.mrb[17].mxu0  ;;  %v1460_v56 = vpop.f32.mrb[18].mxu1 }
 0x231   : > { %v1339_v57 = vpop.f32.mrb[18].mxu0  ;;  %v2987_v58 = vpop.f32.mrb[19].mxu1 }
 0x232   : > { %v1464_v59 = vadd.f32 %v1457_v51, %v1343_v54  ;;  %v1344_v60 = vadd.f32 %v1339_v57, %v1223_v49  ;;  %v2967_v61 = vpop.f32.mrb[19].mxu0 }
 0x234   : > { %v1465_v62 = vadd.f32 %v1460_v56, %v1344_v60 }
 0x24e   : > { %v1699_v63 = vpop.f32.mrb[20].mxu1 }
 0x24f   : > { %v1578_v0 = vpop.f32.mrb[20].mxu0  ;;  %v3026_v1 = vpop.f32.mrb[21].mxu1 }
 0x250   : > { %v1585_v3 = vadd.f32 %v1578_v0, %v1464_v59  ;;  %v3006_v4 = vpop.f32.mrb[21].mxu0  ;;  %v1702_v2 = vpop.f32.mrb[22].mxu1 }
 0x251   : > { %v1581_v5 = vpop.f32.mrb[22].mxu0  ;;  %v3027_v6 = vpop.f32.mrb[23].mxu1 }
 0x252   : > { %v1706_v7 = vadd.f32 %v1699_v63, %v1585_v3  ;;  %v1586_v8 = vadd.f32 %v1581_v5, %v1465_v62  ;;  %v3007_v9 = vpop.f32.mrb[23].mxu0 }
 0x254   : > { %v1707_v10 = vadd.f32 %v1702_v2, %v1586_v8 }
 0x26e   : > { %v1941_v11 = vpop.f32.mrb[24].mxu1 }
 0x26f   : > { %v1820_v12 = vpop.f32.mrb[24].mxu0  ;;  %v3066_v38 = vpop.f32.mrb[25].mxu1 }
 0x270   : > { %v1827_v13 = vadd.f32 %v1820_v12, %v1706_v7  ;;  %v3046_v14 = vpop.f32.mrb[25].mxu0  ;;  %v1944_v15 = vpop.f32.mrb[26].mxu1 }
 0x271   : > { %v1823_v16 = vpop.f32.mrb[26].mxu0  ;;  %v3067_v17 = vpop.f32.mrb[27].mxu1 }
 0x272   : > { %v1948_v18 = vadd.f32 %v1941_v11, %v1827_v13  ;;  %v1828_v19 = vadd.f32 %v1823_v16, %v1707_v10  ;;  %v3047_v20 = vpop.f32.mrb[27].mxu0 }
 0x274   : > { %v1949_v21 = vadd.f32 %v1944_v15, %v1828_v19 }
 0x28e   : > { %v2183_v43 = vpop.f32.mrb[28].mxu1 }
 0x28f   : > { %v2062_v22 = vpop.f32.mrb[28].mxu0  ;;  %v3106_v23 = vpop.f32.mrb[29].mxu1 }
 0x290   : > { %v2069_v24 = vadd.f32 %v2062_v22, %v1948_v18  ;;  %v3086_v25 = vpop.f32.mrb[29].mxu0  ;;  %v2186_v26 = vpop.f32.mrb[30].mxu1 }
 0x291   : > { %v2065_v28 = vpop.f32.mrb[30].mxu0  ;;  %v3107_v29 = vpop.f32.mrb[31].mxu1 }
 0x292   : > { %v2190_v30 = vadd.f32 %v2183_v43, %v2069_v24  ;;  %v2070_v31 = vadd.f32 %v2065_v28, %v1949_v21  ;;  %v3087_v32 = vpop.f32.mrb[31].mxu0 }
 0x294   : > { %v2199_v33 = vadd.f32 %v2619_v27, %v2190_v30  ;;  %v2191_v34 = vadd.f32 %v2186_v26, %v2070_v31 }
 0x296   : > { %v2200_v35 = vadd.f32 %v2619_v27, %v2191_v34  ;;  %v2201_v36 = vmax.f32 %v2199_v33, 0.0 }
 0x298   : > { %v2202_v37 = vmax.f32 %v2200_v35, 0.0 }
 0x29a   : > { %v2203_v39 = vpack.c.bf16 %v2202_v37, %v2201_v36 }
 0x29c   : > { %3125 = vmatmul.mubr.bf16.vlgmr.msra.gmra.mrb[32].mxu0 %v2203_v39 }
 0x36f   : > { %v2309_v41 = vpop.f32.mrb[32].mxu0 }
 0x370   : > { %v2310_v42 = vadd.f32 %v2620_v40, %v2309_v41  ;;  %v3126_v44 = vpop.f32.mrb[33].mxu0 }
 0x371   : > { %v2312_v45 = vpop.f32.mrb[34].mxu0 }
 0x372   : > { %2316 = vst [vmem:[%s248_s16] sm:$0xff] %v2310_v42  ;;  %v2313_v46 = vadd.f32 %v2620_v40, %v2312_v45  ;;  %v3127_v47 = vpop.f32.mrb[35].mxu0 }
 0x374   : > { %2317 = vst [vmem:[%s248_s16 + $0x8] sm:$0xff] %v2313_v46 }
 0x375   : > { %3442 = shalt.err (!%p3439_p11)
}
 0x376   : > { %s3443_s9 = scalar_lea.hbm %s3950_s8, 256  ;;  %s3447_s13 = scalar_lea.hbm %s3998_s5, 512 }
 0x377   : > { %p3444_p13 = scmp.ne.s32.totalorder %s3950_s8, %s3443_s9  ;;  %p3448_p6 = scmp.lt.u32.totalorder %s3950_s8, %s3998_s5 }
 0x378   : > { %p3449_p9 = scmp.lt.u32.totalorder %s3447_s13, %s3443_s9  ;;  %p3451_p10 = scmp.lt.u32.totalorder %s3443_s9, %s3950_s8 }
 0x379   : > { %p3445_p5 = pnand %p3444_p13, %p4011_p1 }
 0x37a   : > { %p3450_p12 = por %p3449_p9, %p3448_p6 }
 0x37b   : > { %p3446_p0 = pneg %p3445_p5 }
 0x37c   : > { %p3452_p2 = por %p3451_p10, %p3450_p12 }
 0x37e   : > { %p3453_p3 = pnand %p3452_p2, %p3446_p0 }
 0x380   : > { %3456 = shalt.err (!%p3453_p3)
}
 0x381   : > { %s3525_s16 = smov 128   ;;  %s3526_s7 = smov 8  }
 0x382   : > { %3136 = dma.vmem_to_hbm [thread:$0]  (%p4011_p1), %s3945_s17, 256, %s3950_s8, %s3952_s30, %s3525_s16, %s3525_s16, %s3526_s7  }
 0x383 PF: > { %p3153_p4 = scmp.ge.s32.totalorder %s3499_s21, 2  ;;  %s2347_s23 = sand.u32 1, %s3487_s18  }
 0x384   : > { %p4012_p7 = scmp.ne.s32.totalorder %s4003_s29, 0  ;;  %s2348_s6 = scalar_lea.sflag [#allocation4], %s2347_s23 }
 0x386   : > { %p3146_p8 = pnand %p3153_p4, %p4012_p7 }
 0x388   : > { %3482 = dma.done.wait (!%p3146_p8), %s2348_s6, 256  }
 0x389   : > { %3484 = vsyncadd (!%p3146_p8), %s2348_s6, 4294967040  ;;  %p17_p11 = scmp.ge.s32.totalorder %s3582_s24, 4   ;;  %s4013_s18 = smov %s3491_s19 }
 0x38a   : > { %s4014_s19 = smov %s3495_s20  ;;  %s4015_s20 = smov %s3593_s27 }
 0x38b   : > { %s4016_s21 = smov %s3582_s24  ;;  %19 = sbr.rel (!%p17_p11) target bundleno = 5 (0x5), region = 99 }
 0x392   :  { %2353 = vsyncpa [#allocation3], 1 }
 0x393   :  { %2355 = vsyncpa [#allocation3 + $0x1], 1 }
 0x394   :  { %2356 = vsyncpa [#allocation6], 1 }
 0x395   :  { %2357 = vsyncpa [#allocation4], 1 }
 0x396   :  { %2359 = vsyncpa [#allocation4 + $0x1], 1 }

</bundles_post_ra>
